<compile_context>
chip_gen: v7x
topology: tpu7x:2x2x1
jax: 0.10.0
libtpu: 0.0.40
codegen_flags: <defaults>
</compile_context>

<pallas_src>
import functools
import math

import jax
import jax.numpy as jnp
import numpy as np
from jax.experimental import pallas as pl
from jax.experimental.pallas import tpu as pltpu

F32 = jnp.float32
BF16 = jnp.bfloat16

# Kernel parameter order (after the 4 activation inputs).
_PARAM_ORDER = (
    'sa_wq', 'sa_wk', 'sa_wv', 'sa_bq', 'sa_bk', 'sa_bv', 'sa_wo', 'sa_bo',
    'ca_wq', 'ca_wk', 'ca_wv', 'ca_bq', 'ca_bk', 'ca_bv', 'ca_wo', 'ca_bo',
    'w1', 'b1', 'w2', 'b2',
    'ln1_g', 'ln1_b', 'ln2_g', 'ln2_b', 'ln3_g', 'ln3_b',
)


# -----------------------------------------------------------------------------
# Fused decoder-layer kernel: one grid step == one batch element.
# -----------------------------------------------------------------------------

def _decoder_layer_kernel(
    # activations (per-batch 2-D tiles)
    x_ref, mem_ref, pos_ref, qpos_ref,
    # self-attention params: Wq/Wk/Wv/Wo are (E,E) bf16, biases (1,E) f32
    sa_wq, sa_wk, sa_wv, sa_bq, sa_bk, sa_bv, sa_wo, sa_bo,
    # cross-attention params
    ca_wq, ca_wk, ca_wv, ca_bq, ca_bk, ca_bv, ca_wo, ca_bo,
    # FFN params: w1 (E,FF) bf16, b1 (1,FF) f32, w2 (FF,E) bf16, b2 (1,E) f32
    w1, b1, w2, b2,
    # LayerNorm params (each (1,E) f32)
    ln1_g, ln1_b, ln2_g, ln2_b, ln3_g, ln3_b,
    # output tile (L, E)
    o_ref,
    *, nhead):
    L, E = x_ref.shape
    S = mem_ref.shape[0]
    Dh = E // nhead
    scale = 1.0 / math.sqrt(Dh)

    x = x_ref[...].astype(F32)        # (L, E)
    qpos = qpos_ref[...].astype(F32)  # (L, E)
    mem = mem_ref[...].astype(F32)    # (S, E)
    pos = pos_ref[...].astype(F32)    # (S, E)

    def layer_norm(z, g_ref, b_ref):
        # LayerNorm over last dim, eps = 1e-5 (torch default); rsqrt rides EUP.
        mu = jnp.mean(z, axis=-1, keepdims=True)
        var = jnp.mean(jnp.square(z - mu), axis=-1, keepdims=True)
        return (z - mu) * jax.lax.rsqrt(var + 1e-5) * g_ref[...] + b_ref[...]

    def mha(q_src, k_src, v_src, wq, wk, wv, bq, bk, bv, wo, bo, Lq, Skv):
        # Projections: bf16 operands, f32 accumulation.
        q = jnp.dot(q_src.astype(BF16), wq[...], preferred_element_type=F32) + bq[...]
        k = jnp.dot(k_src.astype(BF16), wk[...], preferred_element_type=F32) + bk[...]
        v = jnp.dot(v_src.astype(BF16), wv[...], preferred_element_type=F32) + bv[...]
        # Heads as a batch dimension: one batched matmul + one softmax.
        q3 = q.reshape(Lq, nhead, Dh).astype(BF16)
        k3 = k.reshape(Skv, nhead, Dh).astype(BF16)
        v3 = v.reshape(Skv, nhead, Dh).astype(BF16)
        s = jnp.einsum('qhd,khd->hqk', q3, k3,
                       preferred_element_type=F32) * scale       # (H, Lq, Skv)
        m = jnp.max(s, axis=-1, keepdims=True)
        p = jnp.exp(s - m)
        p = p * pl.reciprocal(jnp.sum(p, axis=-1, keepdims=True), approx=True)
        o = jnp.einsum('hqk,khd->qhd', p.astype(BF16), v3,
                       preferred_element_type=F32)                # (Lq, H, Dh)
        o = o.reshape(Lq, E)                                      # contiguous head merge
        # Single full-E (K=E) out-projection.
        return jnp.dot(o.astype(BF16), wo[...], preferred_element_type=F32) + bo[...]

    # ---- self-attention:  x = LN1(2x + SA(q=k=x+qpos, v=x)) -----------------
    qk_src = x + qpos
    sa = mha(qk_src, qk_src, x,
             sa_wq, sa_wk, sa_wv, sa_bq, sa_bk, sa_bv, sa_wo, sa_bo, L, L)
    x = layer_norm(x + x + sa, ln1_g, ln1_b)

    # ---- cross-attention: x = LN2(2x + CA(q=x+qpos, k=mem+pos, v=mem)) ------
    ca = mha(x + qpos, mem + pos, mem,
             ca_wq, ca_wk, ca_wv, ca_bq, ca_bk, ca_bv, ca_wo, ca_bo, L, S)
    x = layer_norm(x + x + ca, ln2_g, ln2_b)

    # ---- feed-forward:     x = LN3(2x + W2 relu(W1 x)) ----------------------
    h = jnp.dot(x.astype(BF16), w1[...], preferred_element_type=F32) + b1[...]
    h = jnp.maximum(h, 0.0)
    ff = jnp.dot(h.astype(BF16), w2[...], preferred_element_type=F32) + b2[...]
    x = layer_norm(x + x + ff, ln3_g, ln3_b)

    o_ref[...] = x.astype(o_ref.dtype)


# -----------------------------------------------------------------------------
# Parameter prep (once): torch layouts -> MXU-friendly bf16 (K,N) weights,
# in-proj split into Wq/Wk/Wv, biases / LN params as (1,N) f32 rows.
# -----------------------------------------------------------------------------

def prepare_params(p, weight_dtype=BF16):
    E = p['sa_w_out'].shape[0]

    def wT(w):
        return jnp.asarray(w, dtype=F32).T.astype(weight_dtype)

    def row(b):
        return jnp.asarray(b, dtype=F32).reshape(1, -1)

    out = {}
    for pre in ('sa', 'ca'):
        w_in = jnp.asarray(p[f'{pre}_w_in'], dtype=F32)
        b_in = jnp.asarray(p[f'{pre}_b_in'], dtype=F32)
        out[f'{pre}_wq'] = wT(w_in[:E])
        out[f'{pre}_wk'] = wT(w_in[E:2 * E])
        out[f'{pre}_wv'] = wT(w_in[2 * E:])
        out[f'{pre}_bq'] = row(b_in[:E])
        out[f'{pre}_bk'] = row(b_in[E:2 * E])
        out[f'{pre}_bv'] = row(b_in[2 * E:])
        out[f'{pre}_wo'] = wT(p[f'{pre}_w_out'])
        out[f'{pre}_bo'] = row(p[f'{pre}_b_out'])
    out['w1'] = wT(p['w1'])
    out['b1'] = row(p['b1'])
    out['w2'] = wT(p['w2'])
    out['b2'] = row(p['b2'])
    for i in (1, 2, 3):
        out[f'ln{i}_g'] = row(p[f'ln{i}_g'])
        out[f'ln{i}_b'] = row(p[f'ln{i}_b'])
    return out


def _cost_estimate(L, S, N, E, FF, H):
    flops = 0
    flops += 4 * 2 * N * L * E * E       # self-attn q,k,v,out projections
    flops += 2 * 2 * N * L * L * E       # self-attn scores + p@v
    flops += 2 * 2 * N * L * E * E       # cross-attn q + out projections
    flops += 2 * 2 * N * S * E * E       # cross-attn k,v projections
    flops += 2 * 2 * N * L * S * E       # cross-attn scores + p@v
    flops += 2 * 2 * N * L * E * FF      # FFN
    transcendentals = N * H * L * (L + S) + N * H * L * 2 + 3 * N * L
    bytes_accessed = (
        4 * (3 * N * L * E + 2 * N * S * E)       # f32 activations in/out
        + 2 * (8 * E * E + 2 * E * FF)            # bf16 weights
        + 4 * (8 * E + FF + E + 6 * E))           # f32 biases + LN params
    return pl.CostEstimate(flops=flops, transcendentals=transcendentals,
                           bytes_accessed=bytes_accessed)


# -----------------------------------------------------------------------------
# Jitted forward: batch grid + (None, rows, E) blocks, weights whole-resident.
# -----------------------------------------------------------------------------

@functools.partial(jax.jit, static_argnames=('nhead',))
def decoder_layer_forward(params, tgt, memory, pos, query_pos, *, nhead):
    L, N, E = tgt.shape
    S = memory.shape[0]
    FF = params['w1'].shape[1]

    # Batch-first layout for the per-batch grid blocks (lane axis stays E).
    x = jnp.transpose(tgt, (1, 0, 2))          # (N, L, E)
    mem = jnp.transpose(memory, (1, 0, 2))     # (N, S, E)
    posb = jnp.transpose(pos, (1, 0, 2))       # (N, S, E)
    qposb = jnp.transpose(query_pos, (1, 0, 2))

    act_specs = [
        pl.BlockSpec((None, L, E), lambda n: (n, 0, 0)),   # x
        pl.BlockSpec((None, S, E), lambda n: (n, 0, 0)),   # memory
        pl.BlockSpec((None, S, E), lambda n: (n, 0, 0)),   # pos
        pl.BlockSpec((None, L, E), lambda n: (n, 0, 0)),   # query_pos
    ]
    weight_args = [params[k] for k in _PARAM_ORDER]
    weight_specs = [
        pl.BlockSpec(a.shape, lambda n, _nd=a.ndim: (0,) * _nd)
        for a in weight_args
    ]

    kernel = functools.partial(_decoder_layer_kernel, nhead=nhead)
    out = pl.pallas_call(
        kernel,
        grid=(N,),
        out_shape=jax.ShapeDtypeStruct((N, L, E), jnp.float32),
        in_specs=act_specs + weight_specs,
        out_specs=pl.BlockSpec((None, L, E), lambda n: (n, 0, 0)),
        compiler_params=pltpu.CompilerParams(
            dimension_semantics=("parallel",)),
        cost_estimate=_cost_estimate(L, S, N, E, FF, nhead),
    )(x, mem, posb, qposb, *weight_args)

    return jnp.transpose(out, (1, 0, 2))       # back to (L, N, E)


# -----------------------------------------------------------------------------
# Pure-JAX f32 reference (torch-layout params) for correctness checking.
# -----------------------------------------------------------------------------

def _ref_mha(query, key, value, w_in, b_in, w_out, b_out, nhead):
    Lq, N, E = query.shape
    S = key.shape[0]
    Dh = E // nhead
    Wq, Wk, Wv = w_in[:E], w_in[E:2 * E], w_in[2 * E:]
    bq, bk, bv = b_in[:E], b_in[E:2 * E], b_in[2 * E:]
    q = query @ Wq.T + bq
    k = key @ Wk.T + bk
    v = value @ Wv.T + bv
    q = q.reshape(Lq, N, nhead, Dh).transpose(1, 2, 0, 3)
    k = k.reshape(S, N, nhead, Dh).transpose(1, 2, 0, 3)
    v = v.reshape(S, N, nhead, Dh).transpose(1, 2, 0, 3)
    s = jnp.einsum('nhqd,nhkd->nhqk', q, k) / jnp.sqrt(jnp.float32(Dh))
    a = jax.nn.softmax(s, axis=-1)
    o = jnp.einsum('nhqk,nhkd->nhqd', a, v)
    o = o.transpose(2, 0, 1, 3).reshape(Lq, N, E)
    return o @ w_out.T + b_out


def _ref_ln(x, g, b):
    mu = jnp.mean(x, axis=-1, keepdims=True)
    var = jnp.mean((x - mu) ** 2, axis=-1, keepdims=True)
    return (x - mu) * jax.lax.rsqrt(var + 1e-5) * g + b


def _ref_forward(p, tgt, memory, pos, query_pos):
    x = tgt
    qk = x + query_pos
    sa = _ref_mha(qk, qk, x, p['sa_w_in'], p['sa_b_in'],
                  p['sa_w_out'], p['sa_b_out'], p['nhead'])
    x = _ref_ln(x + (x + sa), p['ln1_g'], p['ln1_b'])
    ca = _ref_mha(x + query_pos, memory + pos, memory,
                  p['ca_w_in'], p['ca_b_in'], p['ca_w_out'], p['ca_b_out'],
                  p['nhead'])
    x = _ref_ln(x + (x + ca), p['ln2_g'], p['ln2_b'])
    ff = jnp.maximum(x @ p['w1'].T + p['b1'], 0.0) @ p['w2'].T + p['b2']
    x = _ref_ln(x + (x + ff), p['ln3_g'], p['ln3_b'])
    return x


# -----------------------------------------------------------------------------
# Main
# -----------------------------------------------------------------------------

if __name__ == "__main__":
    d_model, nhead, dim_ff = 32, 4, 64
    L, S, N = 8, 16, 2          # tgt seq, memory seq, batch

    key = jax.random.PRNGKey(0)
    ks = jax.random.split(key, 24)
    nrm = lambda k, shp: (0.02 * jax.random.normal(k, shp)).astype(jnp.float32)

    params = {
        'nhead': nhead,
        # self-attention (torch layouts)
        'sa_w_in': nrm(ks[0], (3 * d_model, d_model)),
        'sa_b_in': nrm(ks[1], (3 * d_model,)),
        'sa_w_out': nrm(ks[2], (d_model, d_model)),
        'sa_b_out': nrm(ks[3], (d_model,)),
        # cross-attention
        'ca_w_in': nrm(ks[4], (3 * d_model, d_model)),
        'ca_b_in': nrm(ks[5], (3 * d_model,)),
        'ca_w_out': nrm(ks[6], (d_model, d_model)),
        'ca_b_out': nrm(ks[7], (d_model,)),
        # FFN
        'w1': nrm(ks[8], (dim_ff, d_model)),
        'b1': nrm(ks[9], (dim_ff,)),
        'w2': nrm(ks[10], (d_model, dim_ff)),
        'b2': nrm(ks[11], (d_model,)),
        # LayerNorms
        'ln1_g': (1.0 + 0.01 * jax.random.normal(ks[12], (d_model,))).astype(jnp.float32),
        'ln1_b': nrm(ks[13], (d_model,)),
        'ln2_g': (1.0 + 0.01 * jax.random.normal(ks[14], (d_model,))).astype(jnp.float32),
        'ln2_b': nrm(ks[15], (d_model,)),
        'ln3_g': (1.0 + 0.01 * jax.random.normal(ks[16], (d_model,))).astype(jnp.float32),
        'ln3_b': nrm(ks[17], (d_model,)),
    }

    tgt = jax.random.normal(ks[18], (L, N, d_model), jnp.float32)
    memory = jax.random.normal(ks[19], (S, N, d_model), jnp.float32)
    pos = jax.random.normal(ks[20], (S, N, d_model), jnp.float32)
    query_pos = jax.random.normal(ks[21], (L, N, d_model), jnp.float32)

    prepped = prepare_params(params)
    out = decoder_layer_forward(prepped, tgt, memory, pos, query_pos, nhead=nhead)
    out = jax.block_until_ready(out)

    ref = _ref_forward(params, tgt, memory, pos, query_pos)
    # Tolerance loosened vs a pure-f32 kernel: bf16 MXU operands + approx
    # reciprocal in the softmax denominator.
    np.testing.assert_allclose(np.asarray(out), np.asarray(ref),
                               rtol=2e-2, atol=2e-2)

    print("KERNEL_OK")
</pallas_src>

<mosaic_0001>
module attributes {stable_mosaic.version = 11 : i64} {
  func.func @_decoder_layer_kernel(%arg0: i32, %arg1: memref<1x8x32xf32, #tpu.memory_space<vmem>>, %arg2: memref<1x16x32xf32, #tpu.memory_space<vmem>>, %arg3: memref<1x16x32xf32, #tpu.memory_space<vmem>>, %arg4: memref<1x8x32xf32, #tpu.memory_space<vmem>>, %arg5: memref<32x32xbf16, #tpu.memory_space<vmem>>, %arg6: memref<32x32xbf16, #tpu.memory_space<vmem>>, %arg7: memref<32x32xbf16, #tpu.memory_space<vmem>>, %arg8: memref<1x32xf32, #tpu.memory_space<vmem>>, %arg9: memref<1x32xf32, #tpu.memory_space<vmem>>, %arg10: memref<1x32xf32, #tpu.memory_space<vmem>>, %arg11: memref<32x32xbf16, #tpu.memory_space<vmem>>, %arg12: memref<1x32xf32, #tpu.memory_space<vmem>>, %arg13: memref<32x32xbf16, #tpu.memory_space<vmem>>, %arg14: memref<32x32xbf16, #tpu.memory_space<vmem>>, %arg15: memref<32x32xbf16, #tpu.memory_space<vmem>>, %arg16: memref<1x32xf32, #tpu.memory_space<vmem>>, %arg17: memref<1x32xf32, #tpu.memory_space<vmem>>, %arg18: memref<1x32xf32, #tpu.memory_space<vmem>>, %arg19: memref<32x32xbf16, #tpu.memory_space<vmem>>, %arg20: memref<1x32xf32, #tpu.memory_space<vmem>>, %arg21: memref<32x64xbf16, #tpu.memory_space<vmem>>, %arg22: memref<1x64xf32, #tpu.memory_space<vmem>>, %arg23: memref<64x32xbf16, #tpu.memory_space<vmem>>, %arg24: memref<1x32xf32, #tpu.memory_space<vmem>>, %arg25: memref<1x32xf32, #tpu.memory_space<vmem>>, %arg26: memref<1x32xf32, #tpu.memory_space<vmem>>, %arg27: memref<1x32xf32, #tpu.memory_space<vmem>>, %arg28: memref<1x32xf32, #tpu.memory_space<vmem>>, %arg29: memref<1x32xf32, #tpu.memory_space<vmem>>, %arg30: memref<1x32xf32, #tpu.memory_space<vmem>>, %arg31: memref<1x8x32xf32, #tpu.memory_space<vmem>>) attributes {dimension_semantics = [#tpu.dimension_semantics<parallel>], iteration_bounds = array<i64: 2>, scalar_prefetch = 0 : i64, scratch_operands = 0 : i64, tpu.core_type = #tpu.core_type<tc>, window_params = [{transform_indices = @transform_0, window_bounds = array<i64: 1, 8, 32>}, {transform_indices = @transform_1, window_bounds = array<i64: 1, 16, 32>}, {transform_indices = @transform_2, window_bounds = array<i64: 1, 16, 32>}, {transform_indices = @transform_3, window_bounds = array<i64: 1, 8, 32>}, {pipeline_mode = #tpu.pipeline_mode<synchronous>, transform_indices = @transform_4, window_bounds = array<i64: 32, 32>}, {pipeline_mode = #tpu.pipeline_mode<synchronous>, transform_indices = @transform_5, window_bounds = array<i64: 32, 32>}, {pipeline_mode = #tpu.pipeline_mode<synchronous>, transform_indices = @transform_6, window_bounds = array<i64: 32, 32>}, {pipeline_mode = #tpu.pipeline_mode<synchronous>, transform_indices = @transform_7, window_bounds = array<i64: 1, 32>}, {pipeline_mode = #tpu.pipeline_mode<synchronous>, transform_indices = @transform_8, window_bounds = array<i64: 1, 32>}, {pipeline_mode = #tpu.pipeline_mode<synchronous>, transform_indices = @transform_9, window_bounds = array<i64: 1, 32>}, {pipeline_mode = #tpu.pipeline_mode<synchronous>, transform_indices = @transform_10, window_bounds = array<i64: 32, 32>}, {pipeline_mode = #tpu.pipeline_mode<synchronous>, transform_indices = @transform_11, window_bounds = array<i64: 1, 32>}, {pipeline_mode = #tpu.pipeline_mode<synchronous>, transform_indices = @transform_12, window_bounds = array<i64: 32, 32>}, {pipeline_mode = #tpu.pipeline_mode<synchronous>, transform_indices = @transform_13, window_bounds = array<i64: 32, 32>}, {pipeline_mode = #tpu.pipeline_mode<synchronous>, transform_indices = @transform_14, window_bounds = array<i64: 32, 32>}, {pipeline_mode = #tpu.pipeline_mode<synchronous>, transform_indices = @transform_15, window_bounds = array<i64: 1, 32>}, {pipeline_mode = #tpu.pipeline_mode<synchronous>, transform_indices = @transform_16, window_bounds = array<i64: 1, 32>}, {pipeline_mode = #tpu.pipeline_mode<synchronous>, transform_indices = @transform_17, window_bounds = array<i64: 1, 32>}, {pipeline_mode = #tpu.pipeline_mode<synchronous>, transform_indices = @transform_18, window_bounds = array<i64: 32, 32>}, {pipeline_mode = #tpu.pipeline_mode<synchronous>, transform_indices = @transform_19, window_bounds = array<i64: 1, 32>}, {pipeline_mode = #tpu.pipeline_mode<synchronous>, transform_indices = @transform_20, window_bounds = array<i64: 32, 64>}, {pipeline_mode = #tpu.pipeline_mode<synchronous>, transform_indices = @transform_21, window_bounds = array<i64: 1, 64>}, {pipeline_mode = #tpu.pipeline_mode<synchronous>, transform_indices = @transform_22, window_bounds = array<i64: 64, 32>}, {pipeline_mode = #tpu.pipeline_mode<synchronous>, transform_indices = @transform_23, window_bounds = array<i64: 1, 32>}, {pipeline_mode = #tpu.pipeline_mode<synchronous>, transform_indices = @transform_24, window_bounds = array<i64: 1, 32>}, {pipeline_mode = #tpu.pipeline_mode<synchronous>, transform_indices = @transform_25, window_bounds = array<i64: 1, 32>}, {pipeline_mode = #tpu.pipeline_mode<synchronous>, transform_indices = @transform_26, window_bounds = array<i64: 1, 32>}, {pipeline_mode = #tpu.pipeline_mode<synchronous>, transform_indices = @transform_27, window_bounds = array<i64: 1, 32>}, {pipeline_mode = #tpu.pipeline_mode<synchronous>, transform_indices = @transform_28, window_bounds = array<i64: 1, 32>}, {pipeline_mode = #tpu.pipeline_mode<synchronous>, transform_indices = @transform_29, window_bounds = array<i64: 1, 32>}, {transform_indices = @transform_30, window_bounds = array<i64: 1, 8, 32>}]} {
    %c0 = arith.constant 0 : index
    %c0_0 = arith.constant 0 : index
    %c0_1 = arith.constant 0 : index
    %0 = vector.load %arg1[%c0, %c0_0, %c0_1] : memref<1x8x32xf32, #tpu.memory_space<vmem>>, vector<1x8x32xf32>
    %1 = vector.shape_cast %0 : vector<1x8x32xf32> to vector<8x32xf32>
    %c0_2 = arith.constant 0 : index
    %c0_3 = arith.constant 0 : index
    %c0_4 = arith.constant 0 : index
    %2 = vector.load %arg4[%c0_2, %c0_3, %c0_4] : memref<1x8x32xf32, #tpu.memory_space<vmem>>, vector<1x8x32xf32>
    %3 = vector.shape_cast %2 : vector<1x8x32xf32> to vector<8x32xf32>
    %c0_5 = arith.constant 0 : index
    %c0_6 = arith.constant 0 : index
    %c0_7 = arith.constant 0 : index
    %4 = vector.load %arg2[%c0_5, %c0_6, %c0_7] : memref<1x16x32xf32, #tpu.memory_space<vmem>>, vector<1x16x32xf32>
    %5 = vector.shape_cast %4 : vector<1x16x32xf32> to vector<16x32xf32>
    %c0_8 = arith.constant 0 : index
    %c0_9 = arith.constant 0 : index
    %c0_10 = arith.constant 0 : index
    %6 = vector.load %arg3[%c0_8, %c0_9, %c0_10] : memref<1x16x32xf32, #tpu.memory_space<vmem>>, vector<1x16x32xf32>
    %7 = vector.shape_cast %6 : vector<1x16x32xf32> to vector<16x32xf32>
    %8 = arith.addf %1, %3 : vector<8x32xf32>
    %9 = arith.truncf %8 : vector<8x32xf32> to vector<8x32xbf16>
    %c0_11 = arith.constant 0 : index
    %c0_12 = arith.constant 0 : index
    %10 = vector.load %arg5[%c0_11, %c0_12] : memref<32x32xbf16, #tpu.memory_space<vmem>>, vector<32x32xbf16>
    %cst = arith.constant dense<0.000000e+00> : vector<8x32xf32>
    %11 = tpu.matmul %9, %10, %cst {dimension_numbers = #tpu.dot_dimension_numbers<[1], [0], [0], [1], [0, 0, 1, 1], [], []>} : vector<8x32xbf16>, vector<32x32xbf16>, vector<8x32xf32> -> vector<8x32xf32>
    %c0_13 = arith.constant 0 : index
    %c0_14 = arith.constant 0 : index
    %12 = vector.load %arg8[%c0_13, %c0_14] : memref<1x32xf32, #tpu.memory_space<vmem>>, vector<1x32xf32>
    %13 = vector.broadcast %12 : vector<1x32xf32> to vector<8x32xf32>
    %14 = arith.addf %11, %13 : vector<8x32xf32>
    %15 = arith.truncf %8 : vector<8x32xf32> to vector<8x32xbf16>
    %c0_15 = arith.constant 0 : index
    %c0_16 = arith.constant 0 : index
    %16 = vector.load %arg6[%c0_15, %c0_16] : memref<32x32xbf16, #tpu.memory_space<vmem>>, vector<32x32xbf16>
    %cst_17 = arith.constant dense<0.000000e+00> : vector<8x32xf32>
    %17 = tpu.matmul %15, %16, %cst_17 {dimension_numbers = #tpu.dot_dimension_numbers<[1], [0], [0], [1], [0, 0, 1, 1], [], []>} : vector<8x32xbf16>, vector<32x32xbf16>, vector<8x32xf32> -> vector<8x32xf32>
    %c0_18 = arith.constant 0 : index
    %c0_19 = arith.constant 0 : index
    %18 = vector.load %arg9[%c0_18, %c0_19] : memref<1x32xf32, #tpu.memory_space<vmem>>, vector<1x32xf32>
    %19 = vector.broadcast %18 : vector<1x32xf32> to vector<8x32xf32>
    %20 = arith.addf %17, %19 : vector<8x32xf32>
    %21 = arith.truncf %1 : vector<8x32xf32> to vector<8x32xbf16>
    %c0_20 = arith.constant 0 : index
    %c0_21 = arith.constant 0 : index
    %22 = vector.load %arg7[%c0_20, %c0_21] : memref<32x32xbf16, #tpu.memory_space<vmem>>, vector<32x32xbf16>
    %cst_22 = arith.constant dense<0.000000e+00> : vector<8x32xf32>
    %23 = tpu.matmul %21, %22, %cst_22 {dimension_numbers = #tpu.dot_dimension_numbers<[1], [0], [0], [1], [0, 0, 1, 1], [], []>} : vector<8x32xbf16>, vector<32x32xbf16>, vector<8x32xf32> -> vector<8x32xf32>
    %c0_23 = arith.constant 0 : index
    %c0_24 = arith.constant 0 : index
    %24 = vector.load %arg10[%c0_23, %c0_24] : memref<1x32xf32, #tpu.memory_space<vmem>>, vector<1x32xf32>
    %25 = vector.broadcast %24 : vector<1x32xf32> to vector<8x32xf32>
    %26 = arith.addf %23, %25 : vector<8x32xf32>
    %27 = vector.shape_cast %14 : vector<8x32xf32> to vector<8x4x8xf32>
    %28 = arith.truncf %27 : vector<8x4x8xf32> to vector<8x4x8xbf16>
    %29 = vector.shape_cast %20 : vector<8x32xf32> to vector<8x4x8xf32>
    %30 = arith.truncf %29 : vector<8x4x8xf32> to vector<8x4x8xbf16>
    %31 = vector.shape_cast %26 : vector<8x32xf32> to vector<8x4x8xf32>
    %32 = arith.truncf %31 : vector<8x4x8xf32> to vector<8x4x8xbf16>
    "tpu.trace_start"() <{level = 10 : i32, message = "qhd,khd->hqk"}> : () -> ()
    %cst_25 = arith.constant dense<0.000000e+00> : vector<4x8x8xf32>
    %33 = tpu.matmul %28, %30, %cst_25 {dimension_numbers = #tpu.dot_dimension_numbers<[2], [2], [0], [0], [0, 1, 0, 0, 1, 0], [1], [1]>} : vector<8x4x8xbf16>, vector<8x4x8xbf16>, vector<4x8x8xf32> -> vector<4x8x8xf32>
    "tpu.trace_stop"() : () -> ()
    %cst_26 = arith.constant 0.353553385 : f32
    %34 = vector.broadcast %cst_26 : f32 to vector<4x8x8xf32>
    %35 = arith.mulf %33, %34 : vector<4x8x8xf32>
    %cst_27 = arith.constant dense<0xFF800000> : vector<4x8xf32>
    %36 = vector.multi_reduction <maximumf>, %35, %cst_27 [2] : vector<4x8x8xf32> to vector<4x8xf32>
    %37 = vector.shape_cast %36 : vector<4x8xf32> to vector<4x8x1xf32>
    %38 = vector.broadcast %37 : vector<4x8x1xf32> to vector<4x8x8xf32>
    %39 = arith.subf %35, %38 : vector<4x8x8xf32>
    %40 = math.exp %39 : vector<4x8x8xf32>
    %cst_28 = arith.constant dense<0.000000e+00> : vector<4x8xf32>
    %41 = vector.multi_reduction <add>, %40, %cst_28 [2] : vector<4x8x8xf32> to vector<4x8xf32>
    %42 = vector.shape_cast %41 : vector<4x8xf32> to vector<4x8x1xf32>
    %43 = tpu.reciprocal %42 {approx = true} : vector<4x8x1xf32> -> vector<4x8x1xf32>
    %44 = vector.broadcast %43 : vector<4x8x1xf32> to vector<4x8x8xf32>
    %45 = arith.mulf %40, %44 : vector<4x8x8xf32>
    %46 = arith.truncf %45 : vector<4x8x8xf32> to vector<4x8x8xbf16>
    "tpu.trace_start"() <{level = 10 : i32, message = "hqk,khd->qhd"}> : () -> ()
    %cst_29 = arith.constant dense<0.000000e+00> : vector<4x8x8xf32>
    %47 = tpu.matmul %32, %46, %cst_29 {dimension_numbers = #tpu.dot_dimension_numbers<[0], [2], [2], [1], [0, 1, 0, 2, 1, 1], [1], [0]>} : vector<8x4x8xbf16>, vector<4x8x8xbf16>, vector<4x8x8xf32> -> vector<4x8x8xf32>
    %48 = tpu.transpose %47, [2, 0, 1] : vector<4x8x8xf32> -> vector<8x4x8xf32>
    "tpu.trace_stop"() : () -> ()
    %49 = vector.shape_cast %48 : vector<8x4x8xf32> to vector<8x32xf32>
    %50 = arith.truncf %49 : vector<8x32xf32> to vector<8x32xbf16>
    %c0_30 = arith.constant 0 : index
    %c0_31 = arith.constant 0 : index
    %51 = vector.load %arg11[%c0_30, %c0_31] : memref<32x32xbf16, #tpu.memory_space<vmem>>, vector<32x32xbf16>
    %cst_32 = arith.constant dense<0.000000e+00> : vector<8x32xf32>
    %52 = tpu.matmul %50, %51, %cst_32 {dimension_numbers = #tpu.dot_dimension_numbers<[1], [0], [0], [1], [0, 0, 1, 1], [], []>} : vector<8x32xbf16>, vector<32x32xbf16>, vector<8x32xf32> -> vector<8x32xf32>
    %c0_33 = arith.constant 0 : index
    %c0_34 = arith.constant 0 : index
    %53 = vector.load %arg12[%c0_33, %c0_34] : memref<1x32xf32, #tpu.memory_space<vmem>>, vector<1x32xf32>
    %54 = vector.broadcast %53 : vector<1x32xf32> to vector<8x32xf32>
    %55 = arith.addf %52, %54 : vector<8x32xf32>
    %56 = arith.addf %1, %1 : vector<8x32xf32>
    %57 = arith.addf %56, %55 : vector<8x32xf32>
    %cst_35 = arith.constant dense<0.000000e+00> : vector<8xf32>
    %58 = vector.multi_reduction <add>, %57, %cst_35 [1] : vector<8x32xf32> to vector<8xf32>
    %59 = vector.shape_cast %58 : vector<8xf32> to vector<8x1xf32>
    %cst_36 = arith.constant 3.200000e+01 : f32
    %60 = vector.broadcast %cst_36 : f32 to vector<8x1xf32>
    %61 = arith.divf %59, %60 : vector<8x1xf32>
    %62 = vector.broadcast %61 : vector<8x1xf32> to vector<8x32xf32>
    %63 = arith.subf %57, %62 : vector<8x32xf32>
    %64 = arith.mulf %63, %63 : vector<8x32xf32>
    %cst_37 = arith.constant dense<0.000000e+00> : vector<8xf32>
    %65 = vector.multi_reduction <add>, %64, %cst_37 [1] : vector<8x32xf32> to vector<8xf32>
    %66 = vector.shape_cast %65 : vector<8xf32> to vector<8x1xf32>
    %cst_38 = arith.constant 3.200000e+01 : f32
    %67 = vector.broadcast %cst_38 : f32 to vector<8x1xf32>
    %68 = arith.divf %66, %67 : vector<8x1xf32>
    %69 = vector.broadcast %61 : vector<8x1xf32> to vector<8x32xf32>
    %70 = arith.subf %57, %69 : vector<8x32xf32>
    %cst_39 = arith.constant 9.99999974E-6 : f32
    %71 = vector.broadcast %cst_39 : f32 to vector<8x1xf32>
    %72 = arith.addf %68, %71 : vector<8x1xf32>
    %73 = math.rsqrt %72 : vector<8x1xf32>
    %74 = vector.broadcast %73 : vector<8x1xf32> to vector<8x32xf32>
    %75 = arith.mulf %70, %74 : vector<8x32xf32>
    %c0_40 = arith.constant 0 : index
    %c0_41 = arith.constant 0 : index
    %76 = vector.load %arg25[%c0_40, %c0_41] : memref<1x32xf32, #tpu.memory_space<vmem>>, vector<1x32xf32>
    %77 = vector.broadcast %76 : vector<1x32xf32> to vector<8x32xf32>
    %78 = arith.mulf %75, %77 : vector<8x32xf32>
    %c0_42 = arith.constant 0 : index
    %c0_43 = arith.constant 0 : index
    %79 = vector.load %arg26[%c0_42, %c0_43] : memref<1x32xf32, #tpu.memory_space<vmem>>, vector<1x32xf32>
    %80 = vector.broadcast %79 : vector<1x32xf32> to vector<8x32xf32>
    %81 = arith.addf %78, %80 : vector<8x32xf32>
    %82 = arith.addf %81, %3 : vector<8x32xf32>
    %83 = arith.addf %5, %7 : vector<16x32xf32>
    %84 = arith.truncf %82 : vector<8x32xf32> to vector<8x32xbf16>
    %c0_44 = arith.constant 0 : index
    %c0_45 = arith.constant 0 : index
    %85 = vector.load %arg13[%c0_44, %c0_45] : memref<32x32xbf16, #tpu.memory_space<vmem>>, vector<32x32xbf16>
    %cst_46 = arith.constant dense<0.000000e+00> : vector<8x32xf32>
    %86 = tpu.matmul %84, %85, %cst_46 {dimension_numbers = #tpu.dot_dimension_numbers<[1], [0], [0], [1], [0, 0, 1, 1], [], []>} : vector<8x32xbf16>, vector<32x32xbf16>, vector<8x32xf32> -> vector<8x32xf32>
    %c0_47 = arith.constant 0 : index
    %c0_48 = arith.constant 0 : index
    %87 = vector.load %arg16[%c0_47, %c0_48] : memref<1x32xf32, #tpu.memory_space<vmem>>, vector<1x32xf32>
    %88 = vector.broadcast %87 : vector<1x32xf32> to vector<8x32xf32>
    %89 = arith.addf %86, %88 : vector<8x32xf32>
    %90 = arith.truncf %83 : vector<16x32xf32> to vector<16x32xbf16>
    %c0_49 = arith.constant 0 : index
    %c0_50 = arith.constant 0 : index
    %91 = vector.load %arg14[%c0_49, %c0_50] : memref<32x32xbf16, #tpu.memory_space<vmem>>, vector<32x32xbf16>
    %cst_51 = arith.constant dense<0.000000e+00> : vector<16x32xf32>
    %92 = tpu.matmul %90, %91, %cst_51 {dimension_numbers = #tpu.dot_dimension_numbers<[1], [0], [0], [1], [0, 0, 1, 1], [], []>} : vector<16x32xbf16>, vector<32x32xbf16>, vector<16x32xf32> -> vector<16x32xf32>
    %c0_52 = arith.constant 0 : index
    %c0_53 = arith.constant 0 : index
    %93 = vector.load %arg17[%c0_52, %c0_53] : memref<1x32xf32, #tpu.memory_space<vmem>>, vector<1x32xf32>
    %94 = vector.broadcast %93 : vector<1x32xf32> to vector<16x32xf32>
    %95 = arith.addf %92, %94 : vector<16x32xf32>
    %96 = arith.truncf %5 : vector<16x32xf32> to vector<16x32xbf16>
    %c0_54 = arith.constant 0 : index
    %c0_55 = arith.constant 0 : index
    %97 = vector.load %arg15[%c0_54, %c0_55] : memref<32x32xbf16, #tpu.memory_space<vmem>>, vector<32x32xbf16>
    %cst_56 = arith.constant dense<0.000000e+00> : vector<16x32xf32>
    %98 = tpu.matmul %96, %97, %cst_56 {dimension_numbers = #tpu.dot_dimension_numbers<[1], [0], [0], [1], [0, 0, 1, 1], [], []>} : vector<16x32xbf16>, vector<32x32xbf16>, vector<16x32xf32> -> vector<16x32xf32>
    %c0_57 = arith.constant 0 : index
    %c0_58 = arith.constant 0 : index
    %99 = vector.load %arg18[%c0_57, %c0_58] : memref<1x32xf32, #tpu.memory_space<vmem>>, vector<1x32xf32>
    %100 = vector.broadcast %99 : vector<1x32xf32> to vector<16x32xf32>
    %101 = arith.addf %98, %100 : vector<16x32xf32>
    %102 = vector.shape_cast %89 : vector<8x32xf32> to vector<8x4x8xf32>
    %103 = arith.truncf %102 : vector<8x4x8xf32> to vector<8x4x8xbf16>
    %104 = vector.shape_cast %95 : vector<16x32xf32> to vector<16x4x8xf32>
    %105 = arith.truncf %104 : vector<16x4x8xf32> to vector<16x4x8xbf16>
    %106 = vector.shape_cast %101 : vector<16x32xf32> to vector<16x4x8xf32>
    %107 = arith.truncf %106 : vector<16x4x8xf32> to vector<16x4x8xbf16>
    "tpu.trace_start"() <{level = 10 : i32, message = "qhd,khd->hqk"}> : () -> ()
    %cst_59 = arith.constant dense<0.000000e+00> : vector<4x8x16xf32>
    %108 = tpu.matmul %103, %105, %cst_59 {dimension_numbers = #tpu.dot_dimension_numbers<[2], [2], [0], [0], [0, 1, 0, 0, 1, 0], [1], [1]>} : vector<8x4x8xbf16>, vector<16x4x8xbf16>, vector<4x8x16xf32> -> vector<4x8x16xf32>
    "tpu.trace_stop"() : () -> ()
    %cst_60 = arith.constant 0.353553385 : f32
    %109 = vector.broadcast %cst_60 : f32 to vector<4x8x16xf32>
    %110 = arith.mulf %108, %109 : vector<4x8x16xf32>
    %cst_61 = arith.constant dense<0xFF800000> : vector<4x8xf32>
    %111 = vector.multi_reduction <maximumf>, %110, %cst_61 [2] : vector<4x8x16xf32> to vector<4x8xf32>
    %112 = vector.shape_cast %111 : vector<4x8xf32> to vector<4x8x1xf32>
    %113 = vector.broadcast %112 : vector<4x8x1xf32> to vector<4x8x16xf32>
    %114 = arith.subf %110, %113 : vector<4x8x16xf32>
    %115 = math.exp %114 : vector<4x8x16xf32>
    %cst_62 = arith.constant dense<0.000000e+00> : vector<4x8xf32>
    %116 = vector.multi_reduction <add>, %115, %cst_62 [2] : vector<4x8x16xf32> to vector<4x8xf32>
    %117 = vector.shape_cast %116 : vector<4x8xf32> to vector<4x8x1xf32>
    %118 = tpu.reciprocal %117 {approx = true} : vector<4x8x1xf32> -> vector<4x8x1xf32>
    %119 = vector.broadcast %118 : vector<4x8x1xf32> to vector<4x8x16xf32>
    %120 = arith.mulf %115, %119 : vector<4x8x16xf32>
    %121 = arith.truncf %120 : vector<4x8x16xf32> to vector<4x8x16xbf16>
    "tpu.trace_start"() <{level = 10 : i32, message = "hqk,khd->qhd"}> : () -> ()
    %cst_63 = arith.constant dense<0.000000e+00> : vector<4x8x8xf32>
    %122 = tpu.matmul %107, %121, %cst_63 {dimension_numbers = #tpu.dot_dimension_numbers<[0], [2], [2], [1], [0, 1, 0, 2, 1, 1], [1], [0]>} : vector<16x4x8xbf16>, vector<4x8x16xbf16>, vector<4x8x8xf32> -> vector<4x8x8xf32>
    %123 = tpu.transpose %122, [2, 0, 1] : vector<4x8x8xf32> -> vector<8x4x8xf32>
    "tpu.trace_stop"() : () -> ()
    %124 = vector.shape_cast %123 : vector<8x4x8xf32> to vector<8x32xf32>
    %125 = arith.truncf %124 : vector<8x32xf32> to vector<8x32xbf16>
    %c0_64 = arith.constant 0 : index
    %c0_65 = arith.constant 0 : index
    %126 = vector.load %arg19[%c0_64, %c0_65] : memref<32x32xbf16, #tpu.memory_space<vmem>>, vector<32x32xbf16>
    %cst_66 = arith.constant dense<0.000000e+00> : vector<8x32xf32>
    %127 = tpu.matmul %125, %126, %cst_66 {dimension_numbers = #tpu.dot_dimension_numbers<[1], [0], [0], [1], [0, 0, 1, 1], [], []>} : vector<8x32xbf16>, vector<32x32xbf16>, vector<8x32xf32> -> vector<8x32xf32>
    %c0_67 = arith.constant 0 : index
    %c0_68 = arith.constant 0 : index
    %128 = vector.load %arg20[%c0_67, %c0_68] : memref<1x32xf32, #tpu.memory_space<vmem>>, vector<1x32xf32>
    %129 = vector.broadcast %128 : vector<1x32xf32> to vector<8x32xf32>
    %130 = arith.addf %127, %129 : vector<8x32xf32>
    %131 = arith.addf %81, %81 : vector<8x32xf32>
    %132 = arith.addf %131, %130 : vector<8x32xf32>
    %cst_69 = arith.constant dense<0.000000e+00> : vector<8xf32>
    %133 = vector.multi_reduction <add>, %132, %cst_69 [1] : vector<8x32xf32> to vector<8xf32>
    %134 = vector.shape_cast %133 : vector<8xf32> to vector<8x1xf32>
    %cst_70 = arith.constant 3.200000e+01 : f32
    %135 = vector.broadcast %cst_70 : f32 to vector<8x1xf32>
    %136 = arith.divf %134, %135 : vector<8x1xf32>
    %137 = vector.broadcast %136 : vector<8x1xf32> to vector<8x32xf32>
    %138 = arith.subf %132, %137 : vector<8x32xf32>
    %139 = arith.mulf %138, %138 : vector<8x32xf32>
    %cst_71 = arith.constant dense<0.000000e+00> : vector<8xf32>
    %140 = vector.multi_reduction <add>, %139, %cst_71 [1] : vector<8x32xf32> to vector<8xf32>
    %141 = vector.shape_cast %140 : vector<8xf32> to vector<8x1xf32>
    %cst_72 = arith.constant 3.200000e+01 : f32
    %142 = vector.broadcast %cst_72 : f32 to vector<8x1xf32>
    %143 = arith.divf %141, %142 : vector<8x1xf32>
    %144 = vector.broadcast %136 : vector<8x1xf32> to vector<8x32xf32>
    %145 = arith.subf %132, %144 : vector<8x32xf32>
    %cst_73 = arith.constant 9.99999974E-6 : f32
    %146 = vector.broadcast %cst_73 : f32 to vector<8x1xf32>
    %147 = arith.addf %143, %146 : vector<8x1xf32>
    %148 = math.rsqrt %147 : vector<8x1xf32>
    %149 = vector.broadcast %148 : vector<8x1xf32> to vector<8x32xf32>
    %150 = arith.mulf %145, %149 : vector<8x32xf32>
    %c0_74 = arith.constant 0 : index
    %c0_75 = arith.constant 0 : index
    %151 = vector.load %arg27[%c0_74, %c0_75] : memref<1x32xf32, #tpu.memory_space<vmem>>, vector<1x32xf32>
    %152 = vector.broadcast %151 : vector<1x32xf32> to vector<8x32xf32>
    %153 = arith.mulf %150, %152 : vector<8x32xf32>
    %c0_76 = arith.constant 0 : index
    %c0_77 = arith.constant 0 : index
    %154 = vector.load %arg28[%c0_76, %c0_77] : memref<1x32xf32, #tpu.memory_space<vmem>>, vector<1x32xf32>
    %155 = vector.broadcast %154 : vector<1x32xf32> to vector<8x32xf32>
    %156 = arith.addf %153, %155 : vector<8x32xf32>
    %157 = arith.truncf %156 : vector<8x32xf32> to vector<8x32xbf16>
    %c0_78 = arith.constant 0 : index
    %c0_79 = arith.constant 0 : index
    %158 = vector.load %arg21[%c0_78, %c0_79] : memref<32x64xbf16, #tpu.memory_space<vmem>>, vector<32x64xbf16>
    %cst_80 = arith.constant dense<0.000000e+00> : vector<8x64xf32>
    %159 = tpu.matmul %157, %158, %cst_80 {dimension_numbers = #tpu.dot_dimension_numbers<[1], [0], [0], [1], [0, 0, 1, 1], [], []>} : vector<8x32xbf16>, vector<32x64xbf16>, vector<8x64xf32> -> vector<8x64xf32>
    %c0_81 = arith.constant 0 : index
    %c0_82 = arith.constant 0 : index
    %160 = vector.load %arg22[%c0_81, %c0_82] : memref<1x64xf32, #tpu.memory_space<vmem>>, vector<1x64xf32>
    %161 = vector.broadcast %160 : vector<1x64xf32> to vector<8x64xf32>
    %162 = arith.addf %159, %161 : vector<8x64xf32>
    %cst_83 = arith.constant 0.000000e+00 : f32
    %163 = vector.broadcast %cst_83 : f32 to vector<8x64xf32>
    %164 = arith.maximumf %162, %163 : vector<8x64xf32>
    %165 = arith.truncf %164 : vector<8x64xf32> to vector<8x64xbf16>
    %c0_84 = arith.constant 0 : index
    %c0_85 = arith.constant 0 : index
    %166 = vector.load %arg23[%c0_84, %c0_85] : memref<64x32xbf16, #tpu.memory_space<vmem>>, vector<64x32xbf16>
    %cst_86 = arith.constant dense<0.000000e+00> : vector<8x32xf32>
    %167 = tpu.matmul %165, %166, %cst_86 {dimension_numbers = #tpu.dot_dimension_numbers<[1], [0], [0], [1], [0, 0, 1, 1], [], []>} : vector<8x64xbf16>, vector<64x32xbf16>, vector<8x32xf32> -> vector<8x32xf32>
    %c0_87 = arith.constant 0 : index
    %c0_88 = arith.constant 0 : index
    %168 = vector.load %arg24[%c0_87, %c0_88] : memref<1x32xf32, #tpu.memory_space<vmem>>, vector<1x32xf32>
    %169 = vector.broadcast %168 : vector<1x32xf32> to vector<8x32xf32>
    %170 = arith.addf %167, %169 : vector<8x32xf32>
    %171 = arith.addf %156, %156 : vector<8x32xf32>
    %172 = arith.addf %171, %170 : vector<8x32xf32>
    %cst_89 = arith.constant dense<0.000000e+00> : vector<8xf32>
    %173 = vector.multi_reduction <add>, %172, %cst_89 [1] : vector<8x32xf32> to vector<8xf32>
    %174 = vector.shape_cast %173 : vector<8xf32> to vector<8x1xf32>
    %cst_90 = arith.constant 3.200000e+01 : f32
    %175 = vector.broadcast %cst_90 : f32 to vector<8x1xf32>
    %176 = arith.divf %174, %175 : vector<8x1xf32>
    %177 = vector.broadcast %176 : vector<8x1xf32> to vector<8x32xf32>
    %178 = arith.subf %172, %177 : vector<8x32xf32>
    %179 = arith.mulf %178, %178 : vector<8x32xf32>
    %cst_91 = arith.constant dense<0.000000e+00> : vector<8xf32>
    %180 = vector.multi_reduction <add>, %179, %cst_91 [1] : vector<8x32xf32> to vector<8xf32>
    %181 = vector.shape_cast %180 : vector<8xf32> to vector<8x1xf32>
    %cst_92 = arith.constant 3.200000e+01 : f32
    %182 = vector.broadcast %cst_92 : f32 to vector<8x1xf32>
    %183 = arith.divf %181, %182 : vector<8x1xf32>
    %184 = vector.broadcast %176 : vector<8x1xf32> to vector<8x32xf32>
    %185 = arith.subf %172, %184 : vector<8x32xf32>
    %cst_93 = arith.constant 9.99999974E-6 : f32
    %186 = vector.broadcast %cst_93 : f32 to vector<8x1xf32>
    %187 = arith.addf %183, %186 : vector<8x1xf32>
    %188 = math.rsqrt %187 : vector<8x1xf32>
    %189 = vector.broadcast %188 : vector<8x1xf32> to vector<8x32xf32>
    %190 = arith.mulf %185, %189 : vector<8x32xf32>
    %c0_94 = arith.constant 0 : index
    %c0_95 = arith.constant 0 : index
    %191 = vector.load %arg29[%c0_94, %c0_95] : memref<1x32xf32, #tpu.memory_space<vmem>>, vector<1x32xf32>
    %192 = vector.broadcast %191 : vector<1x32xf32> to vector<8x32xf32>
    %193 = arith.mulf %190, %192 : vector<8x32xf32>
    %c0_96 = arith.constant 0 : index
    %c0_97 = arith.constant 0 : index
    %194 = vector.load %arg30[%c0_96, %c0_97] : memref<1x32xf32, #tpu.memory_space<vmem>>, vector<1x32xf32>
    %195 = vector.broadcast %194 : vector<1x32xf32> to vector<8x32xf32>
    %196 = arith.addf %193, %195 : vector<8x32xf32>
    %c0_98 = arith.constant 0 : index
    %c0_99 = arith.constant 0 : index
    %c0_100 = arith.constant 0 : index
    %197 = vector.load %arg31[%c0_98, %c0_99, %c0_100] : memref<1x8x32xf32, #tpu.memory_space<vmem>>, vector<1x8x32xf32>
    %198 = vector.shape_cast %197 : vector<1x8x32xf32> to vector<8x32xf32>
    %199 = vector.shape_cast %196 : vector<8x32xf32> to vector<1x8x32xf32>
    tpu.vector_store %arg31[%c0_98, %c0_99, %c0_100], %199 {strides = array<i32>} : memref<1x8x32xf32, #tpu.memory_space<vmem>>, vector<1x8x32xf32>,
    return
  }
  func.func @transform_0(%arg0: i32) -> (i32, i32, i32) {
    %c0_i32 = arith.constant 0 : i32
    %c0_i32_0 = arith.constant 0 : i32
    %c0_i32_1 = arith.constant 0 : i32
    return %arg0, %c0_i32, %c0_i32_0 : i32, i32, i32
  }
  func.func @transform_1(%arg0: i32) -> (i32, i32, i32) {
    %c0_i32 = arith.constant 0 : i32
    %c0_i32_0 = arith.constant 0 : i32
    %c0_i32_1 = arith.constant 0 : i32
    return %arg0, %c0_i32, %c0_i32_0 : i32, i32, i32
  }
  func.func @transform_2(%arg0: i32) -> (i32, i32, i32) {
    %c0_i32 = arith.constant 0 : i32
    %c0_i32_0 = arith.constant 0 : i32
    %c0_i32_1 = arith.constant 0 : i32
    return %arg0, %c0_i32, %c0_i32_0 : i32, i32, i32
  }
  func.func @transform_3(%arg0: i32) -> (i32, i32, i32) {
    %c0_i32 = arith.constant 0 : i32
    %c0_i32_0 = arith.constant 0 : i32
    %c0_i32_1 = arith.constant 0 : i32
    return %arg0, %c0_i32, %c0_i32_0 : i32, i32, i32
  }
  func.func @transform_4(%arg0: i32) -> (i32, i32) {
    %c0_i32 = arith.constant 0 : i32
    %c0_i32_0 = arith.constant 0 : i32
    %c0_i32_1 = arith.constant 0 : i32
    return %c0_i32, %c0_i32_0 : i32, i32
  }
  func.func @transform_5(%arg0: i32) -> (i32, i32) {
    %c0_i32 = arith.constant 0 : i32
    %c0_i32_0 = arith.constant 0 : i32
    %c0_i32_1 = arith.constant 0 : i32
    return %c0_i32, %c0_i32_0 : i32, i32
  }
  func.func @transform_6(%arg0: i32) -> (i32, i32) {
    %c0_i32 = arith.constant 0 : i32
    %c0_i32_0 = arith.constant 0 : i32
    %c0_i32_1 = arith.constant 0 : i32
    return %c0_i32, %c0_i32_0 : i32, i32
  }
  func.func @transform_7(%arg0: i32) -> (i32, i32) {
    %c0_i32 = arith.constant 0 : i32
    %c0_i32_0 = arith.constant 0 : i32
    %c0_i32_1 = arith.constant 0 : i32
    return %c0_i32, %c0_i32_0 : i32, i32
  }
  func.func @transform_8(%arg0: i32) -> (i32, i32) {
    %c0_i32 = arith.constant 0 : i32
    %c0_i32_0 = arith.constant 0 : i32
    %c0_i32_1 = arith.constant 0 : i32
    return %c0_i32, %c0_i32_0 : i32, i32
  }
  func.func @transform_9(%arg0: i32) -> (i32, i32) {
    %c0_i32 = arith.constant 0 : i32
    %c0_i32_0 = arith.constant 0 : i32
    %c0_i32_1 = arith.constant 0 : i32
    return %c0_i32, %c0_i32_0 : i32, i32
  }
  func.func @transform_10(%arg0: i32) -> (i32, i32) {
    %c0_i32 = arith.constant 0 : i32
    %c0_i32_0 = arith.constant 0 : i32
    %c0_i32_1 = arith.constant 0 : i32
    return %c0_i32, %c0_i32_0 : i32, i32
  }
  func.func @transform_11(%arg0: i32) -> (i32, i32) {
    %c0_i32 = arith.constant 0 : i32
    %c0_i32_0 = arith.constant 0 : i32
    %c0_i32_1 = arith.constant 0 : i32
    return %c0_i32, %c0_i32_0 : i32, i32
  }
  func.func @transform_12(%arg0: i32) -> (i32, i32) {
    %c0_i32 = arith.constant 0 : i32
    %c0_i32_0 = arith.constant 0 : i32
    %c0_i32_1 = arith.constant 0 : i32
    return %c0_i32, %c0_i32_0 : i32, i32
  }
  func.func @transform_13(%arg0: i32) -> (i32, i32) {
    %c0_i32 = arith.constant 0 : i32
    %c0_i32_0 = arith.constant 0 : i32
    %c0_i32_1 = arith.constant 0 : i32
    return %c0_i32, %c0_i32_0 : i32, i32
  }
  func.func @transform_14(%arg0: i32) -> (i32, i32) {
    %c0_i32 = arith.constant 0 : i32
    %c0_i32_0 = arith.constant 0 : i32
    %c0_i32_1 = arith.constant 0 : i32
    return %c0_i32, %c0_i32_0 : i32, i32
  }
  func.func @transform_15(%arg0: i32) -> (i32, i32) {
    %c0_i32 = arith.constant 0 : i32
    %c0_i32_0 = arith.constant 0 : i32
    %c0_i32_1 = arith.constant 0 : i32
    return %c0_i32, %c0_i32_0 : i32, i32
  }
  func.func @transform_16(%arg0: i32) -> (i32, i32) {
    %c0_i32 = arith.constant 0 : i32
    %c0_i32_0 = arith.constant 0 : i32
    %c0_i32_1 = arith.constant 0 : i32
    return %c0_i32, %c0_i32_0 : i32, i32
  }
  func.func @transform_17(%arg0: i32) -> (i32, i32) {
    %c0_i32 = arith.constant 0 : i32
    %c0_i32_0 = arith.constant 0 : i32
    %c0_i32_1 = arith.constant 0 : i32
    return %c0_i32, %c0_i32_0 : i32, i32
  }
  func.func @transform_18(%arg0: i32) -> (i32, i32) {
    %c0_i32 = arith.constant 0 : i32
    %c0_i32_0 = arith.constant 0 : i32
    %c0_i32_1 = arith.constant 0 : i32
    return %c0_i32, %c0_i32_0 : i32, i32
  }
  func.func @transform_19(%arg0: i32) -> (i32, i32) {
    %c0_i32 = arith.constant 0 : i32
    %c0_i32_0 = arith.constant 0 : i32
    %c0_i32_1 = arith.constant 0 : i32
    return %c0_i32, %c0_i32_0 : i32, i32
  }
  func.func @transform_20(%arg0: i32) -> (i32, i32) {
    %c0_i32 = arith.constant 0 : i32
    %c0_i32_0 = arith.constant 0 : i32
    %c0_i32_1 = arith.constant 0 : i32
    return %c0_i32, %c0_i32_0 : i32, i32
  }
  func.func @transform_21(%arg0: i32) -> (i32, i32) {
    %c0_i32 = arith.constant 0 : i32
    %c0_i32_0 = arith.constant 0 : i32
    %c0_i32_1 = arith.constant 0 : i32
    return %c0_i32, %c0_i32_0 : i32, i32
  }
  func.func @transform_22(%arg0: i32) -> (i32, i32) {
    %c0_i32 = arith.constant 0 : i32
    %c0_i32_0 = arith.constant 0 : i32
    %c0_i32_1 = arith.constant 0 : i32
    return %c0_i32, %c0_i32_0 : i32, i32
  }
  func.func @transform_23(%arg0: i32) -> (i32, i32) {
    %c0_i32 = arith.constant 0 : i32
    %c0_i32_0 = arith.constant 0 : i32
    %c0_i32_1 = arith.constant 0 : i32
    return %c0_i32, %c0_i32_0 : i32, i32
  }
  func.func @transform_24(%arg0: i32) -> (i32, i32) {
    %c0_i32 = arith.constant 0 : i32
    %c0_i32_0 = arith.constant 0 : i32
    %c0_i32_1 = arith.constant 0 : i32
    return %c0_i32, %c0_i32_0 : i32, i32
  }
  func.func @transform_25(%arg0: i32) -> (i32, i32) {
    %c0_i32 = arith.constant 0 : i32
    %c0_i32_0 = arith.constant 0 : i32
    %c0_i32_1 = arith.constant 0 : i32
    return %c0_i32, %c0_i32_0 : i32, i32
  }
  func.func @transform_26(%arg0: i32) -> (i32, i32) {
    %c0_i32 = arith.constant 0 : i32
    %c0_i32_0 = arith.constant 0 : i32
    %c0_i32_1 = arith.constant 0 : i32
    return %c0_i32, %c0_i32_0 : i32, i32
  }
  func.func @transform_27(%arg0: i32) -> (i32, i32) {
    %c0_i32 = arith.constant 0 : i32
    %c0_i32_0 = arith.constant 0 : i32
    %c0_i32_1 = arith.constant 0 : i32
    return %c0_i32, %c0_i32_0 : i32, i32
  }
  func.func @transform_28(%arg0: i32) -> (i32, i32) {
    %c0_i32 = arith.constant 0 : i32
    %c0_i32_0 = arith.constant 0 : i32
    %c0_i32_1 = arith.constant 0 : i32
    return %c0_i32, %c0_i32_0 : i32, i32
  }
  func.func @transform_29(%arg0: i32) -> (i32, i32) {
    %c0_i32 = arith.constant 0 : i32
    %c0_i32_0 = arith.constant 0 : i32
    %c0_i32_1 = arith.constant 0 : i32
    return %c0_i32, %c0_i32_0 : i32, i32
  }
  func.func @transform_30(%arg0: i32) -> (i32, i32, i32) {
    %c0_i32 = arith.constant 0 : i32
    %c0_i32_0 = arith.constant 0 : i32
    %c0_i32_1 = arith.constant 0 : i32
    return %arg0, %c0_i32, %c0_i32_0 : i32, i32, i32
  }
}

</mosaic_0001>

<bundles_post_ra>
// kernel: decoder_layer_forward.1
= control target key start
LH: loop header
LB: loop body
LE: loop exit
PB: predicated region body
PF: predicated region fallthrough
CT: control target
= control target key end

     0   :  { %s6628_s6 = smov 1   ;;  %s6629_s10 = smov 2   ;;  %s7418_s0 = inlined_call_operand.smem [shape: u32[31], index: -1, kind: input, shape index: {}] }
   0x1   :  { %s6677_s5 = sld [smem:[%s7418_s0]]   ;;  %s6630_s14 = smov 3  }
   0x2   :  { %s6682_s9 = sld [smem:[%s7418_s0 + %s6628_s6]]   ;;  %s6631_s18 = smov 4  }
   0x3   :  { %s6687_s13 = sld [smem:[%s7418_s0 + %s6629_s10]]   ;;  %s6632_s22 = smov 5  }
   0x4   :  { %s6692_s17 = sld [smem:[%s7418_s0 + %s6630_s14]]   ;;  %s6633_s26 = smov 6  }
   0x5   :  { %s6697_s21 = sld [smem:[%s7418_s0 + %s6631_s18]]   ;;  %s6634_s30 = smov 7  }
   0x6   :  { %s6702_s25 = sld [smem:[%s7418_s0 + %s6632_s22]]   ;;  %s6635_s4 = smov 8  }
   0x7   :  { %s6707_s29 = sld [smem:[%s7418_s0 + %s6633_s26]]   ;;  %s6636_s10 = smov 9  }
   0x8   :  { %s6712_s3 = sld [smem:[%s7418_s0 + %s6634_s30]]   ;;  %s6637_s15 = smov 10  }
   0x9   :  { %s6717_s8 = sld [smem:[%s7418_s0 + %s6635_s4]]   ;;  %s6638_s20 = smov 11  }
   0xa   :  { %s6722_s14 = sld [smem:[%s7418_s0 + %s6636_s10]]   ;;  %s6639_s26 = smov 12  }
   0xb   :  { %s6727_s19 = sld [smem:[%s7418_s0 + %s6637_s15]]   ;;  %s6640_s1 = smov 13  }
   0xc   :  { %s6732_s24 = sld [smem:[%s7418_s0 + %s6638_s20]]   ;;  %s6641_s7 = smov 14  }
   0xd   :  { %s6737_s30 = sld [smem:[%s7418_s0 + %s6639_s26]]   ;;  %s6642_s15 = smov 15  }
   0xe   :  { %s6742_s6 = sld [smem:[%s7418_s0 + %s6640_s1]]   ;;  %s6643_s22 = smov 16  }
   0xf   :  { %s6747_s12 = sld [smem:[%s7418_s0 + %s6641_s7]]   ;;  %s6644_s28 = smov 17  }
  0x10   :  { %s6752_s20 = sld [smem:[%s7418_s0 + %s6642_s15]]   ;;  %s6645_s7 = smov 18  }
  0x11   :  { %s6757_s27 = sld [smem:[%s7418_s0 + %s6643_s22]]   ;;  %s6646_s15 = smov 19  }
  0x12   :  { %s6762_s4 = sld [smem:[%s7418_s0 + %s6644_s28]]   ;;  %s6647_s22 = smov 20  }
  0x13   :  { %7426 = sst [smem:[#allocation2_spill]] %s6737_s30  ;;  %s6648_s28 = smov 21  }
  0x14   :  { %s6777_s30 = sld [smem:[%s7418_s0 + %s6647_s22]]   ;;  %s6651_s22 = smov 24  }
  0x15   :  { %7427 = sst [smem:[#allocation3_spill]] %s6747_s12 }
  0x16   :  { %7428 = sst [smem:[#allocation4_spill]] %s6752_s20 }
  0x17   :  { %s6767_s12 = sld [smem:[%s7418_s0 + %s6645_s7]]   ;;  %s6649_s7 = smov 22  }
  0x18   :  { %7429 = sst [smem:[#allocation5_spill]] %s6762_s4 }
  0x19   :  { %s6772_s20 = sld [smem:[%s7418_s0 + %s6646_s15]]   ;;  %s6650_s15 = smov 23  }
  0x1a   :  { %7432 = sst [smem:[#allocation8_spill]] %s6777_s30 }
  0x1b   :  { %s6782_s4 = sld [smem:[%s7418_s0 + %s6648_s28]]   ;;  %s6652_s28 = smov 25  }
  0x1c   :  { %s6797_s30 = sld [smem:[%s7418_s0 + %s6651_s22]]   ;;  %s6655_s22 = smov 28  }
  0x1d   :  { %7430 = sst [smem:[#allocation6_spill]] %s6767_s12 }
  0x1e   :  { %s6787_s12 = sld [smem:[%s7418_s0 + %s6649_s7]]   ;;  %s6653_s7 = smov 26  }
  0x1f   :  { %7431 = sst [smem:[#allocation7_spill]] %s6772_s20 }
  0x20   :  { %s6792_s20 = sld [smem:[%s7418_s0 + %s6650_s15]]   ;;  %s6654_s15 = smov 27  }
  0x21   :  { %7433 = sst [smem:[#allocation9_spill]] %s6782_s4 }
  0x22   :  { %7436 = sst [smem:[#allocation12_spill]] %s6797_s30 }
  0x23   :  { %s6802_s4 = sld [smem:[%s7418_s0 + %s6652_s28]]   ;;  %s6656_s28 = smov 29  }
  0x24   :  { %7434 = sst [smem:[#allocation10_spill]] %s6787_s12 }
  0x25   :  { %s6807_s12 = sld [smem:[%s7418_s0 + %s6653_s7]]   ;;  %s6657_s7 = smov 30  }
  0x26   :  { %7435 = sst [smem:[#allocation11_spill]] %s6792_s20 }
  0x27   :  { %s6812_s20 = sld [smem:[%s7418_s0 + %s6654_s15]]   ;;  %s6829_s15 = smov 0  }
  0x28   :  { %s6817_s30 = sld [smem:[%s7418_s0 + %s6655_s22]]  }
  0x29   :  { %7437 = sst [smem:[#allocation13_spill]] %s6802_s4 }
  0x2a   :  { %s6822_s4 = sld [smem:[%s7418_s0 + %s6656_s28]]  }
  0x2b   :  { %7438 = sst [smem:[#allocation14_spill]] %s6807_s12 }
  0x2c   :  { %s6827_s12 = sld [smem:[%s7418_s0 + %s6657_s7]]  }
  0x2d LB: > { %s6173_s16 = sadd.s32 4294967295, %s6626_s15   ;;  %p6177_p0 = scmp.ge.s32.totalorder %s6626_s15, 1  ;;  %s6626_s15 = sphi %s6829_s15, %s71_s15  }
  0x2e   : > { %p871_p1 = scmp.lt.s32.totalorder %s6626_s15, 3 }
  0x30   : > { %p872_p2 = pnand %p6177_p0, %p871_p1 }
  0x31   : > { %v6558_v0 = vld [vmem:[%s6702_s25] sm:$0xff] (!%p872_p2)   ;;  %v6658_v1 = vmov (!%p872_p2), 0.0   ;;  %v6559_v2 = vld [vmem:[%s6702_s25 + $0x8] sm:$0xff] (!%p872_p2)   ;;  %vm6659_vm0 = vmmov (!%p872_p2), 0   ;;  %p961_p3 = scmp.lt.s32.totalorder (!%p872_p2), %s6173_s16, 1  ;;  %vm1015_vm1 = vcmask (!%p872_p2), 261120   ;;  %v1204_v24 = vlaneseq (!%p872_p2) }
  0x32   : > { %875 = sbr.rel (%p872_p2) target bundleno = 5091 (0x13e3), region = 140  ;;  %6337 = vmatprep.subr.bf16.mxu1 (!%p872_p2), %v6658_v1  ;;  %6329 = vmatprep.subr.bf16.mxu0 (!%p872_p2), %v6658_v1  ;;  %v6560_v3 = vld [vmem:[%s6697_s21] sm:$0xff] (!%p872_p2)   ;;  %v6561_v4 = vld [vmem:[%s6697_s21 + $0x8] sm:$0xff] (!%p872_p2)   ;;  %s7424_s23 = smov (!%p872_p2), 104   ;;  %v6663_v22 = vmov (!%p872_p2), 1983009808  }
  0x33   : > { %6338 = vmatpush3.bf16.msra.mxu1 (!%p872_p2), %v6558_v0  ;;  %6341 = vmatprep.mubr.msk.bf16.mxu1 (!%p872_p2), %vm6659_vm0, %v6658_v1  ;;  %v6189_v9 = vld [vmem:[%s6717_s8] ss:$0 sm:$0xff] (!%p872_p2)  ;;  %s6661_s26 = smov (!%p872_p2), 120   ;;  %s6662_s28 = smov (!%p872_p2), 112   ;;  %v6563_v20 = vld [vmem:[%s6707_s29 + $0x8] sm:$0xff] (!%p872_p2)   ;;  %v1202_v23 = vunpack.c.l.s4 (!%p872_p2), %v6663_v22  ;;  %v1205_v28 = vshrl.u32 (!%p872_p2), %v1204_v24, 7 }
  0x34   : > { %6339 = vmatprep.subr.bf16.mxu1 (!%p872_p2), %v6658_v1  ;;  %6333 = vmatprep.mubr.msk.bf16.mxu0 (!%p872_p2), %vm6659_vm0, %v6658_v1  ;;  %v6562_v19 = vld [vmem:[%s6707_s29] sm:$0xff] (!%p872_p2)   ;;  %v6664_v25 = vmov (!%p872_p2), 1934713408   ;;  %vm1931_vm2 = vcmask (!%p872_p2), 1043456   ;;  %vm1927_vm3 = vcmask (!%p872_p2), 64512   ;;  %s6666_s1 = smov (!%p872_p2), 16  }
  0x35   : > { %6330 = vmatpush3.bf16.msra.mxu0 (!%p872_p2), %v6560_v3  ;;  %v1234_v26 = vunpack.c.l.s4 (!%p872_p2), %v6664_v25  ;;  %v1203_v27 = vunpack.c.0.s8 (!%p872_p2), %v1202_v23  ;;  %v6185_v61 = vld [vmem:[%s6712_s3] ss:$0 sm:$0xff] (!%p872_p2)  ;;  %s6667_s2 = smov (!%p872_p2), 8   ;;  %s6668_s7 = smov (!%p872_p2), 24   ;;  %vm3044_vm4 = vcmask (!%p872_p2), 130048   ;;  %vm3046_vm5 = vcmask (!%p872_p2), 195584  }
  0x36   : > { %6331 = vmatprep.subr.bf16.mxu0 (!%p872_p2), %v6658_v1  ;;  %vm5978_vm6 = vcmask (!%p872_p2), 523264  }
  0x37   : > { %6340 = vmatpush3.bf16.msra.mxu1 (!%p872_p2), %v6559_v2  ;;  %v1235_v31 = vunpack.c.0.s8 (!%p872_p2), %v1234_v26  ;;  %v6885_v32 = vsub.s32 (!%p872_p2), %v1203_v27, %v1205_v28 }
  0x38   : > { %6353 = vmatprep.subr.bf16.mxu1 (!%p872_p2), %v6658_v1 }
  0x39   : > { %s7454_s16 = smov (!%p961_p3, %s6173_s16), 1  ;;  %6332 = vmatpush3.bf16.msra.mxu0 %v6561_v4  ;;  %v6887_v38 = vsub.s32 %v1235_v31, %v1205_v28 }
  0x3a   : > { %s6851_s0 = sshll.u32 %s7454_s16, 3  ;;  %6345 = vmatprep.subr.bf16.mxu0 %v6658_v1  ;;  %s6263_s10 = sshll.u32 %s7454_s16, 4 }
  0x3b   : > { %s6856_s18 = scalar_lea.vmem %s6677_s5, %s6851_s0  ;;  %s6860_s22 = scalar_lea.vmem %s6692_s17, %s6851_s0 }
  0x3c   : > { %v984_v5 = vld [vmem:[%s6856_s18] sm:$0xff]  ;;  %s969_s11 = scalar_lea.vmem %s6682_s9, %s6263_s10  ;;  %s7439_s16 = sld [smem:[#allocation2_spill]] }
  0x3d   : > { %v985_v6 = vld [vmem:[%s6860_s22] sm:$0xff]  ;;  %v1122_v21 = vpack.c.bf16 %v984_v5, %v984_v5 }
  0x3e   : > { %v990_v7 = vadd.f32 %v985_v6, %v984_v5 }
  0x40   : > { %v991_v8 = vpack.c.bf16 %v990_v7, %v990_v7 }
  0x42   : > { %6342 = vmatmul.mubr.msk.bf16.vlgmr.msra.gmra.mrb[0].mxu1 %vm1015_vm1, %v991_v8  ;;  %6334 = vmatmul.mubr.msk.bf16.vlgmr.msra.gmra.mrb[0].mxu0 %vm1015_vm1, %v991_v8 }
  0x43   : > { %6349 = vmatprep.mubr.msk.bf16.mxu0 %vm6659_vm0, %v6658_v1  ;;  %6355 = vmatprep.mubr.msk.bf16.mxu1 %vm6659_vm0, %v6658_v1 }
  0x44   : > { %6346 = vmatpush3.bf16.msra.mxu0 %v6562_v19 }
  0x45   : > { %6347 = vmatprep.subr.bf16.mxu0 %v6658_v1 }
  0x48   : > { %6348 = vmatpush3.bf16.msra.mxu0 %v6563_v20 }
  0x49   : > { %6359 = vmatprep.subr.bf16.mxu0 %v6658_v1 }
  0x4b   : > { %6350 = vmatmul.mubr.msk.bf16.vlgmr.msra.gmra.mrb[4].mxu0 %vm1015_vm1, %v1122_v21 }
  0x4c   : > { %6361 = vmatprep.mubr.msk.bf16.mxu0 %vm6659_vm0, %v6658_v1 }
 0x115   : > { %v1116_v10 = vpop.f32.mrb[0].mxu1  ;;  %v6876_v15 = vpop.f32.mrb[0].mxu0 }
 0x116   : > { %v1117_v11 = vadd.f32 %v6189_v9, %v1116_v10  ;;  %v6343_v12 = vpop.f32.mrb[1].mxu1  ;;  %v6335_v16 = vpop.f32.mrb[1].mxu0  ;;  %v6903_v0 = vadd.f32 %v6185_v61, %v6876_v15 }
 0x117   : > { %v1119_v13 = vpop.f32.mrb[2].mxu1  ;;  %v1056_v17 = vpop.f32.mrb[2].mxu0 }
 0x118   : > { %1282 = vrot.lane.b32.xlu1 %v1117_v11, %s7424_s23  ;;  %1276 = vrot.lane.b32.xlu0 %v1117_v11, %s6661_s26  ;;  %v6344_v14 = vpop.f32.mrb[3].mxu1  ;;  %v6336_v18 = vpop.f32.mrb[3].mxu0 }
 0x11c   : > { %1279 = vrot.lane.b32.xlu0 %v1117_v11, %s6662_s28 }
 0x18a   : > { %v1283_v29 = vpop.permute.xlu1 %1282  ;;  %v1277_v30 = vpop.permute.xlu0 %1276 }
 0x18b   : > { %v1301_v33 = vcombine.low %v1277_v30, %v1283_v29  ;;  %v1302_v34 = vcombine.high %v1277_v30, %v1283_v29  ;;  %v6665_v29 = vmov 0  }
 0x18d   : > { %v1309_v39 = vrot.slane %v1301_v33, %v6885_v32  ;;  %v1316_v40 = vrot.slane %v1302_v34, %v6885_v32 }
 0x18e   : > { %v1280_v35 = vpop.permute.xlu0 %1279 }
 0x18f   : > { %v1285_v36 = vcombine.low %v1117_v11, %v1280_v35  ;;  %v1286_v37 = vcombine.high %v1117_v11, %v1280_v35 }
 0x191   : > { %v1293_v41 = vrot.slane %v1285_v36, %v6885_v32  ;;  %v1300_v42 = vrot.slane %v1286_v37, %v6885_v32 }
 0x193   : > { %v1318_v43 = vcombine.high %v1293_v41, %v1309_v39  ;;  %v1317_v44 = vcombine.low %v1293_v41, %v1309_v39  ;;  %v1333_v45 = vcombine.low %v1300_v42, %v1316_v40  ;;  %v1334_v48 = vcombine.high %v1300_v42, %v1316_v40 }
 0x195   : > { %v1332_v46 = vrot.slane %v1318_v43, %v6887_v38  ;;  %v1325_v47 = vrot.slane %v1317_v44, %v6887_v38  ;;  %v1341_v51 = vrot.slane %v1333_v45, %v6887_v38  ;;  %v1348_v55 = vrot.slane %v1334_v48, %v6887_v38  ;;  %v6193_v48 = vld [vmem:[%s6722_s14] ss:$0 sm:$0xff] }
 0x197   : > { %v1355_v49 = vpack.c.bf16 %v1332_v46, %v1332_v46  ;;  %v1353_v50 = vpack.c.bf16 %v1325_v47, %v1325_v47  ;;  %v1350_v52 = vcombine.high %v1332_v46, %v6658_v1  ;;  %v1357_v53 = vpack.c.bf16 %v1341_v51, %v1341_v51 }
 0x198   : > { %v1351_v56 = vcombine.high %v1341_v51, %v6658_v1  ;;  %v1359_v57 = vpack.c.bf16 %v1348_v55, %v1348_v55  ;;  %v1352_v59 = vcombine.high %v1348_v55, %v6658_v1  ;;  %v1349_v60 = vcombine.high %v1325_v47, %v6658_v1 }
 0x199   : > { %1541 = vxpose.xlu0.c.b16.start.end [1/1] (short) (narrow) %v1355_v49, 16  ;;  %1509 = vxpose.xlu1.c.b16.start.end [1/1] (short) (narrow) %v1353_v50, 16  ;;  %v1356_v54 = vpack.c.bf16 %v1350_v52, %v1350_v52  ;;  %v1183_v49 = vpop.f32.mrb[4].mxu0 }
 0x19a   : > { %v1358_v58 = vpack.c.bf16 %v1351_v56, %v1351_v56  ;;  %v1360_v62 = vpack.c.bf16 %v1352_v59, %v1352_v59  ;;  %v1354_v63 = vpack.c.bf16 %v1349_v60, %v1349_v60  ;;  %v6924_v51 = vadd.f32 %v6193_v48, %v1183_v49  ;;  %v6351_v52 = vpop.f32.mrb[5].mxu0 }
 0x19d   : > { %1573 = vxpose.xlu0.c.b16.start.end [1/1] (short) (narrow) %v1357_v53, 16  ;;  %1557 = vxpose.xlu1.c.b16.start.end [1/1] (short) (narrow) %v1356_v54, 16  ;;  %v1186_v53 = vpop.f32.mrb[6].mxu0 }
 0x19e   : > { %v6352_v54 = vpop.f32.mrb[7].mxu0 }
 0x1a1   : > { %1605 = vxpose.xlu0.c.b16.start.end [1/1] (short) (narrow) %v1359_v57, 16  ;;  %1589 = vxpose.xlu1.c.b16.start.end [1/1] (short) (narrow) %v1358_v58, 16 }
 0x1a5   : > { %1621 = vxpose.xlu1.c.b16.start.end [1/1] (short) (narrow) %v1360_v62, 16  ;;  %1525 = vxpose.xlu0.c.b16.start.end [1/1] (short) (narrow) %v1354_v63, 16 }
 0x1a9   : > { %1193 = vrot.lane.b32.xlu1 %v6903_v0, %s6662_s28 }
 0x1ad   : > { %1196 = vrot.lane.b32.xlu1 %v6903_v0, %s7424_s23 }
 0x1ae   : > { %1190 = vrot.lane.b32.xlu0 %v6903_v0, %s6661_s26 }
 0x1ff   : > { %v1549_v2 = vpop.trf.xlu0  ;;  %v1517_v3 = vpop.trf.xlu1 }
 0x203   : > { %v1581_v4 = vpop.trf.xlu0  ;;  %v1565_v5 = vpop.trf.xlu1 }
 0x204   : > { %v1637_v8 = vcombine.low %v1517_v3, %v1581_v4 }
 0x206   : > { %v1644_v13 = vrot.slane %v1637_v8, %v6885_v32 }
 0x207   : > { %v1613_v6 = vpop.trf.xlu0  ;;  %v1597_v7 = vpop.trf.xlu1 }
 0x208   : > { %v1645_v9 = vcombine.low %v1549_v2, %v1613_v6 }
 0x20a   : > { %v1652_v10 = vrot.slane %v1645_v9, %v6885_v32 }
 0x20b   : > { %v1629_v11 = vpop.trf.xlu1  ;;  %v1533_v12 = vpop.trf.xlu0 }
 0x20c   : > { %v1679_v14 = vcombine.low %v1565_v5, %v1629_v11  ;;  %v1671_v15 = vcombine.low %v1533_v12, %v1597_v7  ;;  %v1653_v16 = vcombine.low %v1644_v13, %v1652_v10  ;;  %v1654_v17 = vcombine.high %v1644_v13, %v1652_v10 }
 0x20e   : > { %v1686_v18 = vrot.slane %v1679_v14, %v6885_v32  ;;  %v1678_v19 = vrot.slane %v1671_v15, %v6885_v32  ;;  %v1661_v22 = vrot.slane %v1653_v16, %v6887_v38  ;;  %v1668_v23 = vrot.slane %v1654_v17, %v6887_v38 }
 0x210   : > { %v1687_v20 = vcombine.low %v1678_v19, %v1686_v18  ;;  %v1688_v21 = vcombine.high %v1678_v19, %v1686_v18  ;;  %v1709_v31 = vshrl.u32 %v1661_v22, 16  ;;  %v1669_v33 = vcombine.high %v1661_v22, %v6665_v29 }
 0x211   : > { %v1670_v39 = vcombine.high %v1668_v23, %v6665_v29  ;;  %v1725_v40 = vshrl.u32 %v1668_v23, 16 }
 0x212   : > { %v1695_v24 = vrot.slane %v1687_v20, %v6887_v38  ;;  %v1702_v25 = vrot.slane %v1688_v21, %v6887_v38  ;;  %v1717_v44 = vshrl.u32 %v1669_v33, 16 }
 0x213   : > { %v1733_v47 = vshrl.u32 %v1670_v39, 16 }
 0x214   : > { %v1723_v26 = vpack.i.b16 %v1702_v25, %v1668_v23  ;;  %v1707_v27 = vpack.i.b16 %v1695_v24, %v1661_v22  ;;  %v1710_v28 = vshrl.u32 %v1695_v24, 16  ;;  %v1703_v30 = vcombine.high %v1695_v24, %v6665_v29 }
 0x215   : > { %v1704_v36 = vcombine.high %v1702_v25, %v6665_v29  ;;  %v1726_v37 = vshrl.u32 %v1702_v25, 16 }
 0x216   : > { %1801 = vxpose.xlu1.c.b16.start.end [1/1] (short) (narrow) %v1723_v26, 16  ;;  %1737 = vxpose.xlu0.c.b16.start.end [1/1] (short) (narrow) %v1707_v27, 16  ;;  %v1711_v34 = vpack.i.b16 %v1710_v28, %v1709_v31  ;;  %v1715_v35 = vpack.i.b16 %v1703_v30, %v1669_v33  ;;  %v1718_v43 = vshrl.u32 %v1703_v30, 16 }
 0x217   : > { %v1731_v41 = vpack.i.b16 %v1704_v36, %v1670_v39  ;;  %v1727_v42 = vpack.i.b16 %v1726_v37, %v1725_v40  ;;  %v1734_v46 = vshrl.u32 %v1704_v36, 16 }
 0x218   : > { %v1719_v45 = vpack.i.b16 %v1718_v43, %v1717_v44 }
 0x219   : > { %v1735_v50 = vpack.i.b16 %v1734_v46, %v1733_v47 }
 0x21a   : > { %1753 = vxpose.xlu1.c.b16.start.end [1/1] (short) (narrow) %v1711_v34, 16  ;;  %1769 = vxpose.xlu0.c.b16.start.end [1/1] (short) (narrow) %v1715_v35, 16 }
 0x21b   : > { %v1194_v55 = vpop.permute.xlu1 %1193 }
 0x21c   : > { %v1199_v60 = vcombine.low %v6903_v0, %v1194_v55  ;;  %v1200_v61 = vcombine.high %v6903_v0, %v1194_v55 }
 0x21e   : > { %1833 = vxpose.xlu1.c.b16.start.end [1/1] (short) (narrow) %v1731_v41, 16  ;;  %1817 = vxpose.xlu0.c.b16.start.end [1/1] (short) (narrow) %v1727_v42, 16  ;;  %v1207_v2 = vrot.slane %v1199_v60, %v6885_v32  ;;  %v1214_v3 = vrot.slane %v1200_v61, %v6885_v32 }
 0x21f   : > { %v1197_v56 = vpop.permute.xlu1 %1196 }
 0x220   : > { %v1191_v57 = vpop.permute.xlu0 %1190 }
 0x221   : > { %v1215_v58 = vcombine.low %v1191_v57, %v1197_v56  ;;  %v1216_v59 = vcombine.high %v1191_v57, %v1197_v56 }
 0x222   : > { %1785 = vxpose.xlu0.c.b16.start.end [1/1] (short) (narrow) %v1719_v45, 16  ;;  %1362 = vrot.lane.b32.xlu1 %v6924_v51, %s6661_s26 }
 0x223   : > { %v1223_v62 = vrot.slane %v1215_v58, %v6885_v32  ;;  %v1230_v63 = vrot.slane %v1216_v59, %v6885_v32 }
 0x225   : > { %v1231_v4 = vcombine.low %v1207_v2, %v1223_v62  ;;  %v1232_v5 = vcombine.high %v1207_v2, %v1223_v62  ;;  %v1247_v6 = vcombine.low %v1214_v3, %v1230_v63  ;;  %v1248_v7 = vcombine.high %v1214_v3, %v1230_v63 }
 0x226   : > { %1849 = vxpose.xlu0.c.b16.start.end [1/1] (short) (narrow) %v1735_v50, 16  ;;  %1368 = vrot.lane.b32.xlu1 %v6924_v51, %s7424_s23  ;;  %s974_s23 = scalar_lea.vmem %s6687_s13, %s6263_s10  ;;  %s7442_s10 = sld [smem:[#allocation13_spill]] }
 0x227   : > { %v1239_v10 = vrot.slane %v1231_v4, %v6887_v38  ;;  %v1246_v11 = vrot.slane %v1232_v5, %v6887_v38  ;;  %v1255_v0 = vrot.slane %v1247_v6, %v6887_v38  ;;  %v1262_v12 = vrot.slane %v1248_v7, %v6887_v38 }
 0x229   : > { %v1263_v15 = vcombine.high %v1239_v10, %v6658_v1  ;;  %v1264_v16 = vcombine.high %v1246_v11, %v6658_v1  ;;  %v1265_v17 = vcombine.high %v1255_v0, %v6658_v1  ;;  %v1266_v18 = vcombine.high %v1262_v12, %v6658_v1 }
 0x22a   : > { %v6197_v26 = vpack.c.bf16 %v1255_v0, %v1239_v10  ;;  %v6198_v27 = vpack.c.bf16 %v1262_v12, %v1246_v11 }
 0x22b   : > { %v6199_v23 = vpack.c.bf16 %v1265_v17, %v1263_v15  ;;  %v6200_v24 = vpack.c.bf16 %v1266_v18, %v1264_v16 }
 0x22c   : > { %v1454_v36 = vrot.slane %v6197_v26, %v6885_v32  ;;  %v1462_v37 = vrot.slane %v6198_v27, %v6885_v32 }
 0x22d   : > { %v1479_v31 = vrot.slane %v6199_v23, %v6885_v32  ;;  %v1487_v33 = vrot.slane %v6200_v24, %v6885_v32 }
 0x22e   : > { %v1463_v45 = vcombine.low %v1454_v36, %v1462_v37 }
 0x22f   : > { %1365 = vrot.lane.b32.xlu0 %v6924_v51, %s6662_s28  ;;  %v1488_v41 = vcombine.low %v1479_v31, %v1487_v33 }
 0x230   : > { %v1470_v50 = vrot.slane %v1463_v45, %v6887_v38 }
 0x231   : > { %v1495_v47 = vrot.slane %v1488_v41, %v6887_v38 }
 0x232   : > { %v1500_v2 = vshrl.u32 %v1470_v50, 16 }
 0x233   : > { %v1501_v56 = vshrl.u32 %v1495_v47, 16  ;;  %v1499_v63 = vpack.i.b16 %v1495_v47, %v1470_v50  ;;  %v1496_v6 = vcombine.high %v1495_v47, %v6665_v29 }
 0x235   : > { %v1502_v5 = vpack.i.b16 %v1501_v56, %v1500_v2 }
 0x27c   : > { %v1809_v8 = vpop.trf.xlu1  ;;  %v1745_v9 = vpop.trf.xlu0 }
 0x27d   : > { %v1865_v19 = vcombine.low %v1745_v9, %v1809_v8  ;;  %v1471_v8 = vcombine.high %v1470_v50, %v6665_v29  ;;  %v1507_v9 = vshrl.u32 %v1496_v6, 16 }
 0x27f   : > { %v1872_v28 = vrot.slane %v1865_v19, %v6885_v32  ;;  %v1505_v10 = vpack.i.b16 %v1496_v6, %v1471_v8  ;;  %v1506_v11 = vshrl.u32 %v1471_v8, 16 }
 0x280   : > { %v1761_v13 = vpop.trf.xlu1  ;;  %v1777_v14 = vpop.trf.xlu0 }
 0x281   : > { %v1508_v0 = vpack.i.b16 %v1507_v9, %v1506_v11 }
 0x284   : > { %v1841_v20 = vpop.trf.xlu1  ;;  %v1825_v21 = vpop.trf.xlu0 }
 0x285   : > { %v1873_v22 = vcombine.low %v1777_v14, %v1841_v20  ;;  %v1890_v35 = vcombine.low %v1761_v13, %v1825_v21 }
 0x287   : > { %v1880_v25 = vrot.slane %v1873_v22, %v6885_v32  ;;  %v1897_v43 = vrot.slane %v1890_v35, %v6885_v32 }
 0x288   : > { %v1793_v30 = vpop.trf.xlu0 }
 0x289   : > { %v1881_v34 = vcombine.low %v1872_v28, %v1880_v25 }
 0x28b   : > { %v1888_v42 = vrot.slane %v1881_v34, %v6887_v38 }
 0x28c   : > { %v1857_v39 = vpop.trf.xlu0 }
 0x28d   : > { %v1898_v40 = vcombine.low %v1793_v30, %v1857_v39  ;;  %v1889_v48 = vcombine.high %v1888_v42, %v6665_v29  ;;  %v1918_v53 = vshrl.u32 %v1888_v42, 16 }
 0x28f   : > { %v1905_v44 = vrot.slane %v1898_v40, %v6885_v32  ;;  %v1924_v57 = vshrl.u32 %v1889_v48, 16 }
 0x291   : > { %v1906_v46 = vcombine.low %v1897_v43, %v1905_v44 }
 0x293   : > { %v1913_v49 = vrot.slane %v1906_v46, %v6887_v38 }
 0x294   : > { %v1363_v34 = vpop.permute.xlu1 %1362 }
 0x295   : > { %v1917_v52 = vpack.i.b16 %v1913_v49, %v1888_v42  ;;  %v1919_v54 = vshrl.u32 %v1913_v49, 16  ;;  %v1914_v55 = vcombine.high %v1913_v49, %v6665_v29 }
 0x297   : > { %v1933_v58 = vsel %vm1931_vm2, %v1917_v52, 0  ;;  %v1920_v59 = vpack.i.b16 %v1919_v54, %v1918_v53  ;;  %v1923_v60 = vpack.i.b16 %v1914_v55, %v1889_v48  ;;  %v1925_v61 = vshrl.u32 %v1914_v55, 16 }
 0x298   : > { %6354 = vmatpush3.bf16.msra.mxu1 %v1933_v58  ;;  %v1369_v36 = vpop.permute.xlu1 %1368 }
 0x299   : > { %v1979_v62 = vsel %vm1931_vm2, %v1920_v59, 0  ;;  %6365 = vmatprep.subr.bf16.mxu1 %v6658_v1  ;;  %v1926_v3 = vpack.i.b16 %v1925_v61, %v1924_v57  ;;  %v2025_v4 = vsel %vm1931_vm2, %v1923_v60, 0  ;;  %v1387_v39 = vcombine.low %v1363_v34, %v1369_v36 }
 0x29a   : > { %6360 = vmatpush3.bf16.msra.mxu0 %v1979_v62  ;;  %v1388_v53 = vcombine.high %v1363_v34, %v1369_v36 }
 0x29b   : > { %6356 = vmatmul.mubr.msk.bf16.vlgmr.msra.gmra.mrb[4].mxu1 %vm1927_vm3, %v1499_v63  ;;  %6371 = vmatprep.subr.bf16.mxu0 %v6658_v1  ;;  %v2071_v7 = vsel %vm1931_vm2, %v1926_v3, 0  ;;  %v1395_v41 = vrot.slane %v1387_v39, %v6885_v32 }
 0x29c   : > { %6366 = vmatpush3.bf16.msra.mxu1 %v2025_v4  ;;  %6367 = vmatprep.mubr.msk.bf16.mxu1 %vm6659_vm0, %v6658_v1  ;;  %v1402_v55 = vrot.slane %v1388_v53, %v6885_v32 }
 0x29d   : > { %6362 = vmatmul.mubr.msk.bf16.vlgmr.msra.gmra.mrb[8].mxu0 %vm1927_vm3, %v1502_v5  ;;  %6377 = vmatprep.subr.bf16.mxu1 %v6658_v1 }
 0x29e   : > { %6372 = vmatpush3.bf16.msra.mxu0 %v2071_v7  ;;  %6373 = vmatprep.mubr.msk.bf16.mxu0 %vm6659_vm0, %v6658_v1 }
 0x29f   : > { %6383 = vmatprep.subr.bf16.mxu0 %v6658_v1 }
 0x2a1   : > { %v1366_v35 = vpop.permute.xlu0 %1365 }
 0x2a2   : > { %v1371_v37 = vcombine.low %v6924_v51, %v1366_v35  ;;  %v1372_v52 = vcombine.high %v6924_v51, %v1366_v35 }
 0x2a3   : > { %6368 = vmatmul.mubr.msk.bf16.vlgmr.msra.gmra.mrb[8].mxu1 %vm1927_vm3, %v1505_v10 }
 0x2a4   : > { %6379 = vmatprep.mubr.msk.bf16.mxu1 %vm6659_vm0, %v6658_v1  ;;  %v1379_v40 = vrot.slane %v1371_v37, %v6885_v32  ;;  %v1386_v54 = vrot.slane %v1372_v52, %v6885_v32 }
 0x2a5   : > { %6374 = vmatmul.mubr.msk.bf16.vlgmr.msra.gmra.mrb[12].mxu0 %vm1927_vm3, %v1508_v0 }
 0x2a6   : > { %6385 = vmatprep.mubr.msk.bf16.mxu0 %vm6659_vm0, %v6658_v1  ;;  %v1403_v42 = vcombine.low %v1379_v40, %v1395_v41  ;;  %v1404_v56 = vcombine.high %v1379_v40, %v1395_v41  ;;  %v1419_v58 = vcombine.low %v1386_v54, %v1402_v55  ;;  %v1420_v61 = vcombine.high %v1386_v54, %v1402_v55 }
 0x2a8   : > { %v1411_v43 = vrot.slane %v1403_v42, %v6887_v38  ;;  %v1418_v57 = vrot.slane %v1404_v56, %v6887_v38  ;;  %v1427_v60 = vrot.slane %v1419_v58, %v6887_v38  ;;  %v1434_v2 = vrot.slane %v1420_v61, %v6887_v38 }
 0x2aa   : > { %v1435_v44 = vcombine.high %v1411_v43, %v6658_v1  ;;  %v1439_v45 = vpack.c.bf16 %v1411_v43, %v1411_v43  ;;  %v1436_v59 = vcombine.high %v1418_v57, %v6658_v1  ;;  %v1437_v63 = vcombine.high %v1427_v60, %v6658_v1 }
 0x2ab   : > { %v1441_v51 = vpack.c.bf16 %v1418_v57, %v1418_v57  ;;  %v1438_v4 = vcombine.high %v1434_v2, %v6658_v1  ;;  %v1443_v5 = vpack.c.bf16 %v1427_v60, %v1427_v60  ;;  %v1445_v7 = vpack.c.bf16 %v1434_v2, %v1434_v2 }
 0x2ac   : > { %v1440_v46 = vpack.c.bf16 %v1435_v44, %v1435_v44  ;;  %v1442_v62 = vpack.c.bf16 %v1436_v59, %v1436_v59  ;;  %v1444_v3 = vpack.c.bf16 %v1437_v63, %v1437_v63 }
 0x2ad   : > { %v1446_v6 = vpack.c.bf16 %v1438_v4, %v1438_v4 }
 0x36e   : > { %v1969_v12 = vpop.f32.mrb[4].mxu1 }
 0x36f   : > { %v6982_v13 = vmul.f32 0.35355338, %v1969_v12  ;;  %v6357_v14 = vpop.f32.mrb[5].mxu1 }
 0x370   : > { %v1972_v15 = vpop.f32.mrb[6].mxu1  ;;  %v2015_v16 = vpop.f32.mrb[8].mxu0 }
 0x371   : > { %v6984_v17 = vmul.f32 0.35355338, %v2015_v16  ;;  %v6358_v18 = vpop.f32.mrb[7].mxu1  ;;  %v6363_v19 = vpop.f32.mrb[9].mxu0  ;;  %v2117_v20 = vsel %vm1927_vm3, %v6982_v13, -inf }
 0x372   : > { %2118 = vmax.xlane.f32.xlu1 %v2117_v20  ;;  %v2018_v21 = vpop.f32.mrb[10].mxu0 }
 0x373   : > { %v6364_v22 = vpop.f32.mrb[11].mxu0  ;;  %v2120_v23 = vsel %vm1927_vm3, %v6984_v17, -inf }
 0x374   : > { %2121 = vmax.xlane.f32.xlu0 %v2120_v23 }
 0x376   : > { %v2061_v24 = vpop.f32.mrb[8].mxu1 }
 0x377   : > { %v6369_v25 = vpop.f32.mrb[9].mxu1  ;;  %v6995_v47 = vmul.f32 0.35355338, %v2061_v24 }
 0x378   : > { %v2064_v26 = vpop.f32.mrb[10].mxu1  ;;  %v2107_v27 = vpop.f32.mrb[12].mxu0 }
 0x379   : > { %v6370_v28 = vpop.f32.mrb[11].mxu1  ;;  %v6375_v30 = vpop.f32.mrb[13].mxu0  ;;  %v6997_v48 = vmul.f32 0.35355338, %v2107_v27  ;;  %v2123_v49 = vsel %vm1927_vm3, %v6995_v47, -inf }
 0x37a   : > { %v2110_v31 = vpop.f32.mrb[14].mxu0 }
 0x37b   : > { %v6376_v33 = vpop.f32.mrb[15].mxu0  ;;  %v2126_v50 = vsel %vm1927_vm3, %v6997_v48, -inf }
 0x39f   : > { %2165 = vxpose.xlu1.c.b16.start.end [1/1] (short) (narrow) %v1439_v45, 16 }
 0x3a1   : > { %2181 = vxpose.xlu0.c.b16.start.end [1/1] (short) (narrow) %v1440_v46, 16 }
 0x3ac   : > { %2124 = vmax.xlane.f32.xlu1 %v2123_v49 }
 0x3ae   : > { %2127 = vmax.xlane.f32.xlu0 %v2126_v50 }
 0x3d9   : > { %2213 = vxpose.xlu1.c.b16.start.end [1/1] (short) (narrow) %v1442_v62, 16 }
 0x3db   : > { %2197 = vxpose.xlu0.c.b16.start.end [1/1] (short) (narrow) %v1441_v51, 16 }
 0x3dd   : > { %2245 = vxpose.xlu1.c.b16.start.end [1/1] (short) (narrow) %v1444_v3, 16 }
 0x3df   : > { %2229 = vxpose.xlu0.c.b16.start.end [1/1] (short) (narrow) %v1443_v5, 16 }
 0x3e1   : > { %2277 = vxpose.xlu1.c.b16.start.end [1/1] (short) (narrow) %v1446_v6, 16 }
 0x3e3   : > { %2261 = vxpose.xlu0.c.b16.start.end [1/1] (short) (narrow) %v1445_v7, 16 }
 0x3ff   : > { %v2119_v8 = vpop.xlane.xlu1 %2118 }
 0x400   : > { %v2129_v43 = vsub.f32 %v6982_v13, %v2119_v8 }
 0x401   : > { %v2122_v9 = vpop.xlane.xlu0 %2121 }
 0x402   : > { %v2130_v49 = vsub.f32 %v6984_v17, %v2122_v9  ;;  %v2133_v54 = vmul.f32 1.442695, %v2129_v43 }
 0x404   : > { %v2135_v58 = vmul.f32 1.442695, %v2130_v49  ;;  %6580 = vpow2.f32 %v2133_v54 }
 0x405   : > { %v2173_v10 = vpop.trf.xlu1 }
 0x406   : > { %6582 = vpow2.f32 %v2135_v58 }
 0x407   : > { %v2189_v11 = vpop.trf.xlu0 }
 0x40e   : > { %v6581_v63 = vpop.eup %6580 }
 0x40f   : > { %v2141_v2 = vsel %vm1927_vm3, %v6581_v63, 0.0 }
 0x439   : > { %v2125_v0 = vpop.xlane.xlu1 %2124 }
 0x43a   : > { %v2131_v55 = vsub.f32 %v6995_v47, %v2125_v0  ;;  %v6583_v47 = vpop.eup %6582 }
 0x43b   : > { %v2128_v12 = vpop.xlane.xlu0 %2127 }
 0x43c   : > { %v2132_v13 = vsub.f32 %v6997_v48, %v2128_v12  ;;  %v2137_v61 = vmul.f32 1.442695, %v2131_v55  ;;  %v2144_v48 = vsel %vm1927_vm3, %v6583_v47, 0.0 }
 0x43e   : > { %v2139_v62 = vmul.f32 1.442695, %v2132_v13  ;;  %6584 = vpow2.f32 %v2137_v61 }
 0x43f   : > { %v2221_v14 = vpop.trf.xlu1 }
 0x440   : > { %6586 = vpow2.f32 %v2139_v62 }
 0x441   : > { %v2205_v15 = vpop.trf.xlu0 }
 0x443   : > { %v2253_v16 = vpop.trf.xlu1 }
 0x444   : > { %v2327_v19 = vcombine.low %v2189_v11, %v2253_v16 }
 0x445   : > { %v2237_v18 = vpop.trf.xlu0 }
 0x446   : > { %v2293_v21 = vcombine.low %v2173_v10, %v2237_v18  ;;  %v2334_v24 = vrot.slane %v2327_v19, %v6885_v32 }
 0x447   : > { %v2285_v20 = vpop.trf.xlu1 }
 0x448   : > { %v2335_v22 = vcombine.low %v2221_v14, %v2285_v20  ;;  %v2300_v27 = vrot.slane %v2293_v21, %v6885_v32  ;;  %v6585_v51 = vpop.eup %6584 }
 0x449   : > { %v2269_v23 = vpop.trf.xlu0  ;;  %v2147_v4 = vsel %vm1927_vm3, %v6585_v51, 0.0 }
 0x44a   : > { %v2342_v25 = vrot.slane %v2335_v22, %v6885_v32  ;;  %v2301_v26 = vcombine.low %v2205_v15, %v2269_v23  ;;  %v6587_v3 = vpop.eup %6586 }
 0x44b   : > { %v2150_v5 = vsel %vm1927_vm3, %v6587_v3, 0.0 }
 0x44c   : > { %v2343_v28 = vcombine.low %v2334_v24, %v2342_v25  ;;  %v2308_v30 = vrot.slane %v2301_v26, %v6885_v32  ;;  %v2344_v36 = vcombine.high %v2334_v24, %v2342_v25 }
 0x44e   : > { %v2309_v31 = vcombine.low %v2300_v27, %v2308_v30  ;;  %v2351_v33 = vrot.slane %v2343_v28, %v6887_v38  ;;  %v2310_v34 = vcombine.high %v2300_v27, %v2308_v30  ;;  %v2358_v53 = vrot.slane %v2344_v36, %v6887_v38 }
 0x450   : > { %v2317_v35 = vrot.slane %v2309_v31, %v6887_v38  ;;  %v2366_v37 = vshrl.u32 %v2351_v33, 16  ;;  %v2359_v42 = vcombine.high %v2351_v33, %v6665_v29  ;;  %v2324_v46 = vrot.slane %v2310_v34, %v6887_v38 }
 0x451   : > { %v2382_v60 = vshrl.u32 %v2358_v53, 16  ;;  %v2360_v7 = vcombine.high %v2358_v53, %v6665_v29 }
 0x452   : > { %v2363_v39 = vpack.i.b16 %v2351_v33, %v2317_v35  ;;  %v2365_v40 = vshrl.u32 %v2317_v35, 16  ;;  %v2325_v41 = vcombine.high %v2317_v35, %v6665_v29  ;;  %v2374_v52 = vshrl.u32 %v2359_v42, 16 }
 0x453   : > { %v2381_v57 = vshrl.u32 %v2324_v46, 16  ;;  %v2379_v59 = vpack.i.b16 %v2358_v53, %v2324_v46  ;;  %v2326_v6 = vcombine.high %v2324_v46, %v6665_v29  ;;  %v2390_v10 = vshrl.u32 %v2360_v7, 16 }
 0x454   : > { %2393 = vxpose.xlu0.c.b16.start.end [1/1] (short) (narrow) %v2363_v39, 16  ;;  %v2367_v44 = vpack.i.b16 %v2366_v37, %v2365_v40  ;;  %v2373_v45 = vshrl.u32 %v2325_v41, 16  ;;  %v2371_v50 = vpack.i.b16 %v2359_v42, %v2325_v41 }
 0x455   : > { %v2383_v17 = vpack.i.b16 %v2382_v60, %v2381_v57  ;;  %v2389_v8 = vshrl.u32 %v2326_v6, 16  ;;  %v2387_v9 = vpack.i.b16 %v2360_v7, %v2326_v6 }
 0x456   : > { %2409 = vxpose.xlu1.c.b16.start.end [1/1] (short) (narrow) %v2367_v44, 16  ;;  %v2375_v56 = vpack.i.b16 %v2374_v52, %v2373_v45 }
 0x457   : > { %v2391_v11 = vpack.i.b16 %v2390_v10, %v2389_v8 }
 0x458   : > { %2425 = vxpose.xlu0.c.b16.start.end [1/1] (short) (narrow) %v2371_v50, 16 }
 0x45a   : > { %2441 = vxpose.xlu1.c.b16.start.end [1/1] (short) (narrow) %v2375_v56, 16 }
 0x45c   : > { %2457 = vxpose.xlu0.c.b16.start.end [1/1] (short) (narrow) %v2379_v59, 16 }
 0x45e   : > { %2473 = vxpose.xlu1.c.b16.start.end [1/1] (short) (narrow) %v2383_v17, 16 }
 0x469   : > { %2142 = vadd.xlane.f32.xlu0 %v2141_v2 }
 0x46b   : > { %2145 = vadd.xlane.f32.xlu1 %v2144_v48 }
 0x46d   : > { %2148 = vadd.xlane.f32.xlu0 %v2147_v4 }
 0x46f   : > { %2151 = vadd.xlane.f32.xlu1 %v2150_v5 }
 0x49a   : > { %2489 = vxpose.xlu0.c.b16.start.end [1/1] (short) (narrow) %v2387_v9, 16 }
 0x49c   : > { %2505 = vxpose.xlu1.c.b16.start.end [1/1] (short) (narrow) %v2391_v11, 16 }
 0x4ba   : > { %v2401_v0 = vpop.trf.xlu0 }
 0x4bc   : > { %v2417_v12 = vpop.trf.xlu1 }
 0x4be   : > { %v2433_v14 = vpop.trf.xlu0 }
 0x4c0   : > { %v2449_v15 = vpop.trf.xlu1 }
 0x4c2   : > { %v2465_v16 = vpop.trf.xlu0 }
 0x4c3   : > { %v2521_v23 = vcombine.low %v2401_v0, %v2465_v16 }
 0x4c4   : > { %v2481_v18 = vpop.trf.xlu1 }
 0x4c5   : > { %v2546_v26 = vcombine.low %v2417_v12, %v2481_v18  ;;  %v2528_v33 = vrot.slane %v2521_v23, %v6885_v32 }
 0x4c7   : > { %v2553_v40 = vrot.slane %v2546_v26, %v6885_v32 }
 0x4f6   : > { %v2143_v19 = vpop.xlane.xlu0 %2142 }
 0x4f7   : > { %6588 = vrcp.f32 %v2143_v19 }
 0x4f8   : > { %v2146_v20 = vpop.xlane.xlu1 %2145 }
 0x4f9   : > { %6590 = vrcp.f32 %v2146_v20 }
 0x4fa   : > { %v2149_v21 = vpop.xlane.xlu0 %2148 }
 0x4fb   : > { %6592 = vrcp.f32 %v2149_v21 }
 0x4fc   : > { %v2152_v22 = vpop.xlane.xlu1 %2151 }
 0x4fd   : > { %6594 = vrcp.f32 %v2152_v22 }
 0x500   : > { %v2497_v24 = vpop.trf.xlu0 }
 0x501   : > { %v6589_v25 = vpop.eup %6588  ;;  %v2529_v27 = vcombine.low %v2433_v14, %v2497_v24 }
 0x502   : > { %v2513_v28 = vpop.trf.xlu1  ;;  %v2157_v30 = vmul.f32 %v6589_v25, %v6581_v63 }
 0x503   : > { %v6591_v31 = vpop.eup %6590  ;;  %v2536_v34 = vrot.slane %v2529_v27, %v6885_v32  ;;  %v2554_v35 = vcombine.low %v2449_v15, %v2513_v28 }
 0x504   : > { %v2161_v36 = vpack.c.bf16 %v2157_v30, %v2157_v30  ;;  %v2158_v37 = vmul.f32 %v6591_v31, %v6583_v47 }
 0x505   : > { %v6593_v39 = vpop.eup %6592  ;;  %v2537_v41 = vcombine.low %v2528_v33, %v2536_v34  ;;  %v2561_v42 = vrot.slane %v2554_v35, %v6885_v32 }
 0x506   : > { %v2587_v43 = vsel %vm1927_vm3, %v2161_v36, 0  ;;  %v2162_v44 = vpack.c.bf16 %v2158_v37, %v2158_v37  ;;  %v2159_v45 = vmul.f32 %v6593_v39, %v6585_v51  ;;  %v6564_v37 = vld [vmem:[%s6727_s19] sm:$0xff]  }
 0x507   : > { %v6595_v46 = vpop.eup %6594  ;;  %v2544_v49 = vrot.slane %v2537_v41, %v6887_v38  ;;  %v2562_v50 = vcombine.low %v2553_v40, %v2561_v42  ;;  %6378 = vmatpush3.bf16.xpose.msra.mxu1 %v2587_v43 }
 0x508   : > { %v2633_v52 = vsel %vm1927_vm3, %v2162_v44, 0  ;;  %6389 = vmatprep.subr.bf16.mxu1 %v6658_v1  ;;  %v2160_v53 = vmul.f32 %v6595_v46, %v6587_v3  ;;  %v2163_v55 = vpack.c.bf16 %v2159_v45, %v2159_v45 }
 0x509   : > { %v2569_v54 = vrot.slane %v2562_v50, %v6887_v38  ;;  %6384 = vmatpush3.bf16.xpose.msra.mxu0 %v2633_v52  ;;  %v2574_v56 = vshrl.u32 %v2544_v49, 16  ;;  %v2545_v17 = vcombine.high %v2544_v49, %v6665_v29 }
 0x50a   : > { %6395 = vmatprep.subr.bf16.mxu0 %v6658_v1  ;;  %v2164_v13 = vpack.c.bf16 %v2160_v53, %v2160_v53  ;;  %v2679_v61 = vsel %vm1927_vm3, %v2163_v55, 0 }
 0x50b   : > { %v2573_v57 = vpack.i.b16 %v2569_v54, %v2544_v49  ;;  %v2575_v58 = vshrl.u32 %v2569_v54, 16  ;;  %v2570_v60 = vcombine.high %v2569_v54, %v6665_v29  ;;  %v2580_v47 = vshrl.u32 %v2545_v17, 16  ;;  %v6565_v49 = vld [vmem:[%s6727_s19 + $0x8] sm:$0xff]  }
 0x50c   : > { %v2725_v62 = vsel %vm1927_vm3, %v2164_v13, 0 }
 0x50d   : > { %v2576_v59 = vpack.i.b16 %v2575_v58, %v2574_v56  ;;  %v2581_v63 = vshrl.u32 %v2570_v60, 16  ;;  %v2579_v2 = vpack.i.b16 %v2570_v60, %v2545_v17 }
 0x50e   : > { %6380 = vmatmul.mubr.msk.bf16.vlgmr.msra.gmra.mrb[12].mxu1 %vm1927_vm3, %v2573_v57 }
 0x50f   : > { %6390 = vmatpush3.bf16.xpose.msra.mxu1 %v2679_v61  ;;  %6391 = vmatprep.mubr.msk.bf16.mxu1 %vm6659_vm0, %v6658_v1  ;;  %v2582_v51 = vpack.i.b16 %v2581_v63, %v2580_v47 }
 0x510   : > { %6386 = vmatmul.mubr.msk.bf16.vlgmr.msra.gmra.mrb[16].mxu0 %vm1927_vm3, %v2576_v59  ;;  %6401 = vmatprep.subr.bf16.mxu1 %v6658_v1 }
 0x511   : > { %6396 = vmatpush3.bf16.xpose.msra.mxu0 %v2725_v62  ;;  %6397 = vmatprep.mubr.msk.bf16.mxu0 %vm6659_vm0, %v6658_v1 }
 0x512   : > { %6409 = vmatprep.subr.bf16.mxu0 %v6658_v1 }
 0x516   : > { %6392 = vmatmul.mubr.msk.bf16.vlgmr.msra.gmra.mrb[16].mxu1 %vm1927_vm3, %v2579_v2 }
 0x517   : > { %6405 = vmatprep.mubr.msk.bf16.mxu1 %vm6659_vm0, %v6658_v1  ;;  %6402 = vmatpush3.bf16.msra.mxu1 %v6564_v37 }
 0x518   : > { %6398 = vmatmul.mubr.msk.bf16.vlgmr.msra.gmra.mrb[20].mxu0 %vm1927_vm3, %v2582_v51  ;;  %6403 = vmatprep.subr.bf16.mxu1 %v6658_v1 }
 0x519   : > { %6413 = vmatprep.mubr.msk.bf16.mxu0 %vm6659_vm0, %v6658_v1 }
 0x51b   : > { %6404 = vmatpush3.bf16.msra.mxu1 %v6565_v49 }
 0x51c   : > { %6417 = vmatprep.subr.bf16.mxu1 %v6658_v1 }
 0x5e1   : > { %v2623_v48 = vpop.f32.mrb[12].mxu1 }
 0x5e2   : > { %2767 = vxpose.xlu0.b32.start.end [1/1] (short) (narrow) %v2623_v48, 8  ;;  %v6381_v3 = vpop.f32.mrb[13].mxu1 }
 0x5e3   : > { %v2626_v4 = vpop.f32.mrb[14].mxu1  ;;  %v2669_v5 = vpop.f32.mrb[16].mxu0 }
 0x5e4   : > { %v6382_v6 = vpop.f32.mrb[15].mxu1  ;;  %2799 = vxpose.xlu1.b32.start.end [1/1] (short) (narrow) %v2669_v5, 8  ;;  %v6387_v7 = vpop.f32.mrb[17].mxu0  ;;  %v6566_v5 = vld [vmem:[%s6742_s6] sm:$0xff]  }
 0x5e5   : > { %v2672_v8 = vpop.f32.mrb[18].mxu0  ;;  %v7089_v6 = vld [vmem:[%s969_s11] sm:$0xff] }
 0x5e6   : > { %v6388_v9 = vpop.f32.mrb[19].mxu0  ;;  %v7092_v8 = vld [vmem:[%s969_s11 + $0x8] sm:$0xff]  ;;  %s7443_s11 = sld [smem:[#allocation3_spill]] }
 0x5e7   : > { %v988_v9 = vld [vmem:[%s974_s23] sm:$0xff] }
 0x5e9   : > { %v2715_v10 = vpop.f32.mrb[16].mxu1 }
 0x5ea   : > { %2831 = vxpose.xlu0.b32.start.end [1/1] (short) (narrow) %v2715_v10, 8  ;;  %v6393_v11 = vpop.f32.mrb[17].mxu1  ;;  %v989_v10 = vld [vmem:[%s974_s23 + $0x8] sm:$0xff]  ;;  %s7441_s23 = sld [smem:[#allocation12_spill]] }
 0x5eb   : > { %v2718_v0 = vpop.f32.mrb[18].mxu1  ;;  %v2761_v12 = vpop.f32.mrb[20].mxu0 }
 0x5ec   : > { %v6394_v14 = vpop.f32.mrb[19].mxu1  ;;  %v6399_v15 = vpop.f32.mrb[21].mxu0  ;;  %v3148_v0 = vadd.f32 %v988_v9, %v7089_v6 }
 0x5ed   : > { %v2764_v16 = vpop.f32.mrb[22].mxu0  ;;  %v6567_v14 = vld [vmem:[%s6742_s6 + $0x8] sm:$0xff]  }
 0x5ee   : > { %2863 = vxpose.xlu0.b32.start.end [1/1] (short) (narrow) %v2761_v12, 8  ;;  %v6400_v18 = vpop.f32.mrb[23].mxu0  ;;  %v3149_v12 = vadd.f32 %v989_v10, %v7092_v8  ;;  %v6211_v16 = vld [vmem:[%s6732_s24] ss:$0 sm:$0xff] }
 0x5ef   : > { %v6618_v18 = vld [vmem:[%s6856_s18] sm:$0xff]  ;;  %s7440_s18 = smov 104  }
 0x5f0   : > { %v3217_v15 = vpack.c.bf16 %v3149_v12, %v3148_v0 }
 0x662   : > { %v2783_v19 = vpop.trf.xlu0 }
 0x664   : > { %v2815_v21 = vpop.trf.xlu1 }
 0x66a   : > { %v2847_v20 = vpop.trf.xlu0 }
 0x66b   : > { %v2895_v22 = vcombine.low %v2783_v19, %v2847_v20  ;;  %v2896_v23 = vcombine.high %v2783_v19, %v2847_v20  ;;  %v3115_v19 = vadd.f32 %v6618_v18, %v6618_v18 }
 0x66d   : > { %v2903_v27 = vrot.slane %v2895_v22, %v6885_v32  ;;  %v2910_v28 = vrot.slane %v2896_v23, %v6885_v32 }
 0x66e   : > { %v2879_v24 = vpop.trf.xlu0 }
 0x66f   : > { %v2911_v25 = vcombine.low %v2815_v21, %v2879_v24  ;;  %v2912_v26 = vcombine.high %v2815_v21, %v2879_v24 }
 0x671   : > { %v2919_v30 = vrot.slane %v2911_v25, %v6885_v32  ;;  %v2926_v31 = vrot.slane %v2912_v26, %v6885_v32 }
 0x673   : > { %v2927_v33 = vcombine.low %v2903_v27, %v2919_v30  ;;  %v2928_v34 = vcombine.high %v2903_v27, %v2919_v30  ;;  %v2943_v35 = vcombine.low %v2910_v28, %v2926_v31  ;;  %v2944_v36 = vcombine.high %v2910_v28, %v2926_v31 }
 0x675   : > { %v2935_v39 = vrot.slane %v2927_v33, %v6887_v38  ;;  %v2942_v40 = vrot.slane %v2928_v34, %v6887_v38  ;;  %v2951_v41 = vrot.slane %v2943_v35, %v6887_v38  ;;  %v2958_v42 = vrot.slane %v2944_v36, %v6887_v38  ;;  %v6221_v33 = vld [vmem:[%s6757_s27] ss:$0 sm:$0xff] }
 0x677   : > { %v2963_v43 = vcombine.low %v2935_v39, %v2942_v40  ;;  %v6209_v44 = vcombine.high %v2935_v39, %v2942_v40  ;;  %v2979_v45 = vcombine.low %v2951_v41, %v2958_v42  ;;  %v6210_v46 = vcombine.high %v2951_v41, %v2958_v42  ;;  %v6568_v42 = vld [vmem:[%s7439_s16] sm:$0xff]  }
 0x678   : > { %6410 = vmatpush3.bf16.msra.mxu0 %v6568_v42 }
 0x679   : > { %v2970_v50 = vrot.slane %v2963_v43, %v6885_v32  ;;  %v2978_v52 = vrot.slane %v6209_v44, %v6885_v32  ;;  %v2986_v53 = vrot.slane %v2979_v45, %v6885_v32  ;;  %v2994_v54 = vrot.slane %v6210_v46, %v6885_v32  ;;  %6411 = vmatprep.subr.bf16.mxu0 %v6658_v1  ;;  %v6569_v43 = vld [vmem:[%s7439_s16 + $0x8] sm:$0xff]  }
 0x67b   : > { %v2996_v55 = vcombine.high %v2970_v50, %v2978_v52  ;;  %v3012_v56 = vcombine.high %v2986_v53, %v2994_v54  ;;  %v2995_v57 = vcombine.low %v2970_v50, %v2978_v52  ;;  %v3011_v58 = vcombine.low %v2986_v53, %v2994_v54 }
 0x67c   : > { %6412 = vmatpush3.bf16.msra.mxu0 %v6569_v43 }
 0x67d   : > { %v3010_v13 = vrot.slane %v2996_v55, %v6887_v38  ;;  %v3026_v59 = vrot.slane %v3012_v56, %v6887_v38  ;;  %v3003_v60 = vrot.slane %v2995_v57, %v6887_v38  ;;  %v3019_v61 = vrot.slane %v3011_v58, %v6887_v38  ;;  %6425 = vmatprep.subr.bf16.mxu0 %v6658_v1 }
 0x67f   : > { %v3029_v17 = vcombine.low %v3010_v13, %v3026_v59  ;;  %v3028_v62 = vcombine.high %v3003_v60, %v3019_v61  ;;  %v3027_v63 = vcombine.low %v3003_v60, %v3019_v61  ;;  %v3030_v47 = vcombine.high %v3010_v13, %v3026_v59 }
 0x681   : > { %3036 = vrot.lane.b32.xlu0 %v3029_v17, %s6666_s1  ;;  %3032 = vrot.lane.b32.xlu1 %v3028_v62, %s6667_s2 }
 0x685   : > { %3040 = vrot.lane.b32.xlu1 %v3030_v47, %s6668_s7 }
 0x6f3   : > { %v3033_v2 = vpop.permute.xlu1 %3032  ;;  %v3037_v51 = vpop.permute.xlu0 %3036 }
 0x6f4   : > { %v3043_v48 = vsel %vm1927_vm3, %v3027_v63, %v3033_v2  ;;  %v6215_v2 = vld [vmem:[%s7441_s23] ss:$0 sm:$0xff]  ;;  %s7445_s23 = sld [smem:[#allocation5_spill]] }
 0x6f5   : > { %v3045_v4 = vsel %vm3044_vm4, %v3043_v48, %v3037_v51 }
 0x6f7   : > { %v3041_v3 = vpop.permute.xlu1 %3040 }
 0x6f8   : > { %v3047_v7 = vsel %vm3046_vm5, %v3045_v4, %v3041_v3 }
 0x6f9   : > { %v3048_v11 = vpack.c.bf16 %v3047_v7, %v3047_v7 }
 0x6fb   : > { %6406 = vmatmul.mubr.msk.bf16.vlgmr.msra.gmra.mrb[20].mxu1 %vm1015_vm1, %v3048_v11  ;;  %v6216_v11 = vld [vmem:[%s7442_s10] ss:$0 sm:$0xff]  ;;  %s7452_s10 = sld [smem:[#allocation11_spill]] }
 0x6fc   : > { %6418 = vmatpush3.bf16.msra.mxu1 %v6566_v5  ;;  %6421 = vmatprep.mubr.msk.bf16.mxu1 %vm6659_vm0, %v6658_v1 }
 0x6fd   : > { %6419 = vmatprep.subr.bf16.mxu1 %v6658_v1 }
 0x700   : > { %6420 = vmatpush3.bf16.msra.mxu1 %v6567_v14 }
 0x701   : > { %6433 = vmatprep.subr.bf16.mxu1 %v6658_v1 }
 0x703   : > { %6422 = vmatmul.mubr.msk.bf16.vlgmr.msra.gmra.mrb[24].mxu1 %vm1015_vm1, %v3217_v15 }
 0x704   : > { %6435 = vmatprep.mubr.msk.bf16.mxu1 %vm6659_vm0, %v6658_v1 }
 0x7ce   : > { %v3109_v20 = vpop.f32.mrb[20].mxu1 }
 0x7cf   : > { %v3110_v21 = vadd.f32 %v6211_v16, %v3109_v20  ;;  %v6407_v22 = vpop.f32.mrb[21].mxu1 }
 0x7d0   : > { %v3112_v23 = vpop.f32.mrb[22].mxu1 }
 0x7d1   : > { %v6408_v24 = vpop.f32.mrb[23].mxu1  ;;  %v3116_v25 = vadd.f32 %v3115_v19, %v3110_v21  ;;  %v6619_v23 = vld [vmem:[%s6860_s22] sm:$0xff]  ;;  %s7444_s22 = sld [smem:[#allocation4_spill]] }
 0x7d3   : > { %v3117_v26 = vsel %vm1015_vm1, %v3116_v25, 0.0 }
 0x7d4   : > { %3118 = vadd.xlane.f32.xlu1 %v3117_v26 }
 0x7d6   : > { %v3278_v27 = vpop.f32.mrb[24].mxu1 }
 0x7d7   : > { %v6423_v28 = vpop.f32.mrb[25].mxu1  ;;  %v3279_v34 = vadd.f32 %v6221_v33, %v3278_v27 }
 0x7d8   : > { %v3281_v30 = vpop.f32.mrb[26].mxu1  ;;  %v6570_v28 = vld [vmem:[%s7443_s11] sm:$0xff]  }
 0x7d9   : > { %v6424_v31 = vpop.f32.mrb[27].mxu1  ;;  %v7111_v35 = vadd.f32 %v6221_v33, %v3281_v30 }
 0x7e5   : > { %3441 = vrot.lane.b32.xlu1 %v3279_v34, %s6661_s26 }
 0x7e9   : > { %3447 = vrot.lane.b32.xlu1 %v3279_v34, %s6662_s28 }
 0x7ed   : > { %3449 = vrot.lane.b32.xlu1 %v7111_v35, %s6662_s28 }
 0x7f1   : > { %3455 = vrot.lane.b32.xlu1 %v7111_v35, %s7440_s18 }
 0x861   : > { %v3119_v36 = vpop.xlane.xlu1 %3118 }
 0x862   : > { %v3121_v37 = vmul.f32 0.03125, %v3119_v36 }
 0x864   : > { %v3122_v39 = vsub.f32 %v3116_v25, %v3121_v37 }
 0x865   : > { %v3442_v44 = vpop.permute.xlu1 %3441 }
 0x866   : > { %v3123_v40 = vmul.f32 %v3122_v39, %v3122_v39 }
 0x868   : > { %v3124_v41 = vsel %vm1015_vm1, %v3123_v40, 0.0 }
 0x869   : > { %3125 = vadd.xlane.f32.xlu0 %v3124_v41  ;;  %v3448_v49 = vpop.permute.xlu1 %3447  ;;  %v6571_v41 = vld [vmem:[%s7443_s11 + $0x8] sm:$0xff]  }
 0x86a   : > { %v3459_v53 = vcombine.low %v3279_v34, %v3448_v49  ;;  %v3460_v56 = vcombine.high %v3279_v34, %v3448_v49 }
 0x86c   : > { %v3467_v13 = vrot.slane %v3459_v53, %v6885_v32  ;;  %v3474_v17 = vrot.slane %v3460_v56, %v6885_v32 }
 0x86d   : > { %v3450_v54 = vpop.permute.xlu1 %3449 }
 0x86e   : > { %v3527_v5 = vcombine.low %v7111_v35, %v3450_v54  ;;  %v3528_v31 = vcombine.high %v7111_v35, %v3450_v54 }
 0x870   : > { %v3535_v19 = vrot.slane %v3527_v5, %v6885_v32 }
 0x871   : > { %v3456_v61 = vpop.permute.xlu1 %3455 }
 0x87f   : > { %3443 = vrot.lane.b32.xlu0 %v7111_v35, %s6661_s26  ;;  %v3542_v35 = vrot.slane %v3528_v31, %v6885_v32 }
 0x883   : > { %3453 = vrot.lane.b32.xlu0 %v3279_v34, %s7440_s18 }
 0x8f6   : > { %v3126_v45 = vpop.xlane.xlu0 %3125 }
 0x8f7   : > { %v3127_v46 = vmul.f32 0.03125, %v3126_v45 }
 0x8f9   : > { %v3128_v50 = vadd.f32 1e-05, %v3127_v46 }
 0x8fa   : > { %v3444_v52 = vpop.permute.xlu0 %3443 }
 0x8fb   : > { %6596 = vrsqrt.f32 %v3128_v50  ;;  %v3543_v51 = vcombine.low %v3444_v52, %v3456_v61  ;;  %v3544_v22 = vcombine.high %v3444_v52, %v3456_v61 }
 0x8fd   : > { %v3551_v12 = vrot.slane %v3543_v51, %v6885_v32  ;;  %v3558_v36 = vrot.slane %v3544_v22, %v6885_v32 }
 0x8fe   : > { %v3454_v55 = vpop.permute.xlu0 %3453 }
 0x8ff   : > { %v3475_v57 = vcombine.low %v3442_v44, %v3454_v55  ;;  %v3476_v58 = vcombine.high %v3442_v44, %v3454_v55  ;;  %v3559_v27 = vcombine.low %v3535_v19, %v3551_v12  ;;  %v3560_v40 = vcombine.high %v3535_v19, %v3551_v12 }
 0x900   : > { %v3285_v44 = vpack.c.bf16 %v7092_v8, %v7089_v6  ;;  %v3575_v49 = vcombine.low %v3542_v35, %v3558_v36  ;;  %v3576_v55 = vcombine.high %v3542_v35, %v3558_v36 }
 0x901   : > { %v3483_v59 = vrot.slane %v3475_v57, %v6885_v32  ;;  %v3490_v60 = vrot.slane %v3476_v58, %v6885_v32  ;;  %v3574_v46 = vrot.slane %v3560_v40, %v6887_v38 }
 0x902   : > { %v3583_v54 = vrot.slane %v3575_v49, %v6887_v38  ;;  %v3590_v57 = vrot.slane %v3576_v55, %v6887_v38 }
 0x903   : > { %v3491_v62 = vcombine.low %v3467_v13, %v3483_v59  ;;  %v3492_v63 = vcombine.high %v3467_v13, %v3483_v59  ;;  %v3507_v3 = vcombine.low %v3474_v17, %v3490_v60  ;;  %v3508_v16 = vcombine.high %v3474_v17, %v3490_v60 }
 0x904   : > { %v3605_v53 = vpack.c.bf16 %v3574_v46, %v3574_v46  ;;  %v3592_v8 = vcombine.high %v3574_v46, %v6658_v1  ;;  %v3607_v56 = vpack.c.bf16 %v3583_v54, %v3583_v54  ;;  %v3593_v13 = vcombine.high %v3583_v54, %v6658_v1 }
 0x905   : > { %v6597_v47 = vpop.eup %6596  ;;  %v3499_v48 = vrot.slane %v3491_v62, %v6887_v38  ;;  %v3506_v10 = vrot.slane %v3492_v63, %v6887_v38  ;;  %v3515_v15 = vrot.slane %v3507_v3, %v6887_v38  ;;  %v3522_v26 = vrot.slane %v3508_v16, %v6887_v38 }
 0x906   : > { %v3130_v4 = vmul.f32 %v6597_v47, %v3122_v39  ;;  %v3567_v39 = vrot.slane %v3559_v27, %v6887_v38  ;;  %v3606_v58 = vpack.c.bf16 %v3592_v8, %v3592_v8  ;;  %v3609_v59 = vpack.c.bf16 %v3590_v57, %v3590_v57 }
 0x907   : > { %v3595_v7 = vpack.c.bf16 %v3499_v48, %v3499_v48  ;;  %v3523_v9 = vcombine.high %v3499_v48, %v6658_v1  ;;  %v3597_v20 = vpack.c.bf16 %v3506_v10, %v3506_v10  ;;  %v3524_v21 = vcombine.high %v3506_v10, %v6658_v1 }
 0x908   : > { %v3138_v0 = vmul.f32 %v6215_v2, %v3130_v4  ;;  %v3599_v25 = vpack.c.bf16 %v3515_v15, %v3515_v15  ;;  %v3525_v34 = vcombine.high %v3515_v15, %v6658_v1  ;;  %v3601_v37 = vpack.c.bf16 %v3522_v26, %v3522_v26 }
 0x909   : > { %3845 = vxpose.xlu0.c.b16.start.end [1/1] (short) (narrow) %v3595_v7, 16  ;;  %v3596_v14 = vpack.c.bf16 %v3523_v9, %v3523_v9  ;;  %v3598_v33 = vpack.c.bf16 %v3524_v21, %v3524_v21  ;;  %v3526_v43 = vcombine.high %v3522_v26, %v6658_v1  ;;  %v3603_v45 = vpack.c.bf16 %v3567_v39, %v3567_v39 }
 0x90a   : > { %v7137_v18 = vadd.f32 %v6216_v11, %v3138_v0  ;;  %v3600_v42 = vpack.c.bf16 %v3525_v34, %v3525_v34  ;;  %v3591_v52 = vcombine.high %v3567_v39, %v6658_v1  ;;  %v3608_v60 = vpack.c.bf16 %v3593_v13, %v3593_v13 }
 0x90b   : > { %3861 = vxpose.xlu1.c.b16.start.end [1/1] (short) (narrow) %v3596_v14, 16  ;;  %v3602_v50 = vpack.c.bf16 %v3526_v43, %v3526_v43  ;;  %v3594_v61 = vcombine.high %v3590_v57, %v6658_v1 }
 0x90c   : > { %v3147_v24 = vadd.f32 %v6619_v23, %v7137_v18  ;;  %v3604_v6 = vpack.c.bf16 %v3591_v52, %v3591_v52 }
 0x90d   : > { %3877 = vxpose.xlu0.c.b16.start.end [1/1] (short) (narrow) %v3597_v20, 16  ;;  %v3610_v17 = vpack.c.bf16 %v3594_v61, %v3594_v61 }
 0x90e   : > { %v3150_v30 = vpack.c.bf16 %v3147_v24, %v3147_v24 }
 0x90f   : > { %3909 = vxpose.xlu1.c.b16.start.end [1/1] (short) (narrow) %v3599_v25, 16 }
 0x910   : > { %6414 = vmatmul.mubr.msk.bf16.vlgmr.msra.gmra.mrb[24].mxu0 %vm1015_vm1, %v3150_v30 }
 0x911   : > { %3893 = vxpose.xlu0.c.b16.start.end [1/1] (short) (narrow) %v3598_v33, 16  ;;  %6426 = vmatpush3.bf16.msra.mxu0 %v6570_v28 }
 0x912   : > { %6427 = vmatprep.subr.bf16.mxu0 %v6658_v1  ;;  %6429 = vmatprep.mubr.msk.bf16.mxu0 %vm6659_vm0, %v6658_v1 }
 0x913   : > { %3941 = vxpose.xlu1.c.b16.start.end [1/1] (short) (narrow) %v3601_v37, 16 }
 0x915   : > { %3925 = vxpose.xlu0.c.b16.start.end [1/1] (short) (narrow) %v3600_v42, 16  ;;  %6428 = vmatpush3.bf16.msra.mxu0 %v6571_v41 }
 0x916   : > { %6439 = vmatprep.subr.bf16.mxu0 %v6658_v1 }
 0x917   : > { %3973 = vxpose.xlu1.c.b16.start.end [1/1] (short) (narrow) %v3603_v45, 16 }
 0x918   : > { %6430 = vmatmul.mubr.msk.bf16.vlgmr.msra.gmra.mrb[28].mxu0 %vm1015_vm1, %v3285_v44 }
 0x919   : > { %3957 = vxpose.xlu0.c.b16.start.end [1/1] (short) (narrow) %v3602_v50, 16  ;;  %6441 = vmatprep.mubr.msk.bf16.mxu0 %vm6659_vm0, %v6658_v1 }
 0x91b   : > { %4005 = vxpose.xlu1.c.b16.start.end [1/1] (short) (narrow) %v3605_v53, 16 }
 0x91d   : > { %3989 = vxpose.xlu0.c.b16.start.end [1/1] (short) (narrow) %v3604_v6, 16 }
 0x91f   : > { %4037 = vxpose.xlu1.c.b16.start.end [1/1] (short) (narrow) %v3607_v56, 16 }
 0x921   : > { %4021 = vxpose.xlu0.c.b16.start.end [1/1] (short) (narrow) %v3606_v58, 16 }
 0x923   : > { %4069 = vxpose.xlu1.c.b16.start.end [1/1] (short) (narrow) %v3609_v59, 16 }
 0x925   : > { %4053 = vxpose.xlu0.c.b16.start.end [1/1] (short) (narrow) %v3608_v60, 16 }
 0x929   : > { %4085 = vxpose.xlu0.c.b16.start.end [1/1] (short) (narrow) %v3610_v17, 16 }
 0x96f   : > { %v3853_v62 = vpop.trf.xlu0 }
 0x971   : > { %v3869_v63 = vpop.trf.xlu1 }
 0x973   : > { %v3885_v47 = vpop.trf.xlu0 }
 0x975   : > { %v3917_v2 = vpop.trf.xlu1 }
 0x976   : > { %v4101_v10 = vcombine.low %v3853_v62, %v3917_v2 }
 0x977   : > { %v3901_v51 = vpop.trf.xlu0 }
 0x978   : > { %v4108_v19 = vrot.slane %v4101_v10, %v6885_v32 }
 0x979   : > { %v3949_v48 = vpop.trf.xlu1 }
 0x97a   : > { %v4109_v11 = vcombine.low %v3885_v47, %v3949_v48 }
 0x97b   : > { %v3933_v3 = vpop.trf.xlu0 }
 0x97c   : > { %v4169_v15 = vcombine.low %v3869_v63, %v3933_v3  ;;  %v4116_v20 = vrot.slane %v4109_v11, %v6885_v32 }
 0x97d   : > { %v3981_v4 = vpop.trf.xlu1 }
 0x97e   : > { %v4176_v25 = vrot.slane %v4169_v15, %v6885_v32  ;;  %v4133_v30 = vcombine.low %v4108_v19, %v4116_v20  ;;  %v4134_v31 = vcombine.high %v4108_v19, %v4116_v20 }
 0x97f   : > { %v3965_v5 = vpop.trf.xlu0 }
 0x980   : > { %v4177_v16 = vcombine.low %v3901_v51, %v3965_v5  ;;  %v4141_v35 = vrot.slane %v4133_v30, %v6887_v38  ;;  %v4148_v43 = vrot.slane %v4134_v31, %v6887_v38 }
 0x981   : > { %v4013_v7 = vpop.trf.xlu1 }
 0x982   : > { %v4184_v26 = vrot.slane %v4177_v16, %v6885_v32 }
 0x983   : > { %v3997_v9 = vpop.trf.xlu0 }
 0x984   : > { %v4201_v37 = vcombine.low %v4176_v25, %v4184_v26  ;;  %v4202_v39 = vcombine.high %v4176_v25, %v4184_v26 }
 0x985   : > { %v4045_v0 = vpop.trf.xlu1 }
 0x986   : > { %v4117_v12 = vcombine.low %v3981_v4, %v4045_v0  ;;  %v4209_v52 = vrot.slane %v4201_v37, %v6887_v38  ;;  %v4216_v53 = vrot.slane %v4202_v39, %v6887_v38  ;;  %v6217_v0 = vld [vmem:[%s7444_s22] ss:$0 sm:$0xff]  ;;  %s982_s22 = scalar_lea.vmem %s6827_s12, %s6851_s0 }
 0x987   : > { %v4029_v14 = vpop.trf.xlu0 }
 0x988   : > { %v4124_v22 = vrot.slane %v4117_v12, %v6885_v32 }
 0x989   : > { %v4077_v21 = vpop.trf.xlu1 }
 0x98a   : > { %v4125_v23 = vcombine.low %v4013_v7, %v4077_v21 }
 0x98b   : > { %v4061_v24 = vpop.trf.xlu0 }
 0x98c   : > { %v4185_v27 = vcombine.low %v3997_v9, %v4061_v24  ;;  %v4132_v28 = vrot.slane %v4125_v23, %v6885_v32  ;;  %v6225_v24 = vld [vmem:[%s7445_s23] ss:$0 sm:$0xff] }
 0x98e   : > { %v4149_v33 = vcombine.low %v4124_v22, %v4132_v28  ;;  %v4150_v34 = vcombine.high %v4124_v22, %v4132_v28  ;;  %v4192_v40 = vrot.slane %v4185_v27, %v6885_v32 }
 0x98f   : > { %v4093_v36 = vpop.trf.xlu0 }
 0x990   : > { %v4193_v41 = vcombine.low %v4029_v14, %v4093_v36  ;;  %v4157_v42 = vrot.slane %v4149_v33, %v6887_v38  ;;  %v4164_v44 = vrot.slane %v4150_v34, %v6887_v38 }
 0x992   : > { %v4200_v45 = vrot.slane %v4193_v41, %v6885_v32  ;;  %v4168_v46 = vcombine.high %v4148_v43, %v4164_v44  ;;  %v4166_v54 = vcombine.high %v4141_v35, %v4157_v42  ;;  %v4165_v6 = vcombine.low %v4141_v35, %v4157_v42 }
 0x993   : > { %v4167_v56 = vcombine.low %v4148_v43, %v4164_v44 }
 0x994   : > { %v4217_v49 = vcombine.low %v4192_v40, %v4200_v45  ;;  %v4218_v50 = vcombine.high %v4192_v40, %v4200_v45  ;;  %v4249_v57 = vshrl.u32 %v4166_v54, 16  ;;  %v4265_v61 = vshrl.u32 %v4168_v46, 16 }
 0x995   : > { %v4241_v47 = vshrl.u32 %v4165_v6, 16  ;;  %v4257_v2 = vshrl.u32 %v4167_v56, 16 }
 0x996   : > { %v4225_v55 = vrot.slane %v4217_v49, %v6887_v38  ;;  %v4232_v8 = vrot.slane %v4218_v50, %v6887_v38 }
 0x998   : > { %v4234_v58 = vcombine.high %v4209_v52, %v4225_v55  ;;  %v4233_v13 = vcombine.low %v4209_v52, %v4225_v55  ;;  %v4235_v59 = vcombine.low %v4216_v53, %v4232_v8  ;;  %v4236_v60 = vcombine.high %v4216_v53, %v4232_v8 }
 0x99a   : > { %v4247_v17 = vpack.i.b16 %v4234_v58, %v4166_v54  ;;  %v4239_v62 = vpack.i.b16 %v4233_v13, %v4165_v6  ;;  %v4250_v63 = vshrl.u32 %v4234_v58, 16  ;;  %v4263_v51 = vpack.i.b16 %v4236_v60, %v4168_v46 }
 0x99b   : > { %v4266_v48 = vshrl.u32 %v4236_v60, 16  ;;  %v4255_v3 = vpack.i.b16 %v4235_v59, %v4167_v56  ;;  %v4242_v5 = vshrl.u32 %v4233_v13, 16  ;;  %v4258_v7 = vshrl.u32 %v4235_v59, 16 }
 0x99c   : > { %4301 = vxpose.xlu0.c.b16.start.end [1/1] (short) (narrow) %v4247_v17, 16  ;;  %4269 = vxpose.xlu1.c.b16.start.end [1/1] (short) (narrow) %v4239_v62, 16  ;;  %v4251_v4 = vpack.i.b16 %v4250_v63, %v4249_v57 }
 0x99d   : > { %v4267_v9 = vpack.i.b16 %v4266_v48, %v4265_v61  ;;  %v4243_v10 = vpack.i.b16 %v4242_v5, %v4241_v47  ;;  %v4259_v11 = vpack.i.b16 %v4258_v7, %v4257_v2 }
 0x9a0   : > { %4333 = vxpose.xlu0.c.b16.start.end [1/1] (short) (narrow) %v4255_v3, 16  ;;  %4317 = vxpose.xlu1.c.b16.start.end [1/1] (short) (narrow) %v4251_v4, 16 }
 0x9a4   : > { %4285 = vxpose.xlu0.c.b16.start.end [1/1] (short) (narrow) %v4243_v10, 16  ;;  %4349 = vxpose.xlu1.c.b16.start.end [1/1] (short) (narrow) %v4259_v11, 16 }
 0x9e3   : > { %v3211_v12 = vpop.f32.mrb[24].mxu0 }
 0x9e4   : > { %v3212_v14 = vadd.f32 %v6217_v0, %v3211_v12  ;;  %v6415_v15 = vpop.f32.mrb[25].mxu0 }
 0x9e5   : > { %v3214_v16 = vpop.f32.mrb[26].mxu0 }
 0x9e6   : > { %3357 = vrot.lane.b32.xlu0 %v3212_v14, %s6662_s28  ;;  %3354 = vrot.lane.b32.xlu1 %v3212_v14, %s6661_s26  ;;  %v6416_v19 = vpop.f32.mrb[27].mxu0 }
 0x9ea   : > { %3360 = vrot.lane.b32.xlu1 %v3212_v14, %s7440_s18 }
 0x9eb   : > { %v3346_v20 = vpop.f32.mrb[28].mxu0 }
 0x9ec   : > { %v6431_v21 = vpop.f32.mrb[29].mxu0  ;;  %v7190_v25 = vadd.f32 %v6225_v24, %v3346_v20 }
 0x9ed   : > { %v3349_v22 = vpop.f32.mrb[30].mxu0 }
 0x9ee   : > { %v6432_v23 = vpop.f32.mrb[31].mxu0  ;;  %v7194_v26 = vadd.f32 %v6225_v24, %v3349_v22 }
 0xa02   : > { %v4309_v27 = vpop.trf.xlu0  ;;  %v4277_v28 = vpop.trf.xlu1 }
 0xa04   : > { %4365 = vxpose.xlu0.c.b16.start.end [1/1] (short) (narrow) %v4263_v51, 16 }
 0xa06   : > { %v4341_v30 = vpop.trf.xlu0  ;;  %v4325_v31 = vpop.trf.xlu1 }
 0xa07   : > { %v4397_v60 = vcombine.low %v4277_v28, %v4341_v30 }
 0xa09   : > { %v4404_v47 = vrot.slane %v4397_v60, %v6885_v32 }
 0xa0a   : > { %v4293_v33 = vpop.trf.xlu0  ;;  %v4357_v34 = vpop.trf.xlu1 }
 0xa0b   : > { %v4422_v5 = vcombine.low %v4293_v33, %v4357_v34 }
 0xa0d   : > { %4381 = vxpose.xlu1.c.b16.start.end [1/1] (short) (narrow) %v4267_v9, 16  ;;  %3613 = vrot.lane.b32.xlu0 %v7190_v25, %s6661_s26 }
 0xa11   : > { %3619 = vrot.lane.b32.xlu1 %v7190_v25, %s6662_s28  ;;  %3621 = vrot.lane.b32.xlu0 %v7194_v26, %s6662_s28  ;;  %s7447_s28 = sld [smem:[#allocation7_spill]] }
 0xa15   : > { %3625 = vrot.lane.b32.xlu1 %v7190_v25, %s7440_s18  ;;  %3627 = vrot.lane.b32.xlu0 %v7194_v26, %s7440_s18  ;;  %s7451_s18 = sld [smem:[#allocation9_spill]] }
 0xa19   : > { %3615 = vrot.lane.b32.xlu1 %v7194_v26, %s6661_s26  ;;  %s7446_s26 = sld [smem:[#allocation6_spill]] }
 0xa58   : > { %v3358_v36 = vpop.permute.xlu0 %3357  ;;  %v3355_v37 = vpop.permute.xlu1 %3354 }
 0xa59   : > { %v3363_v39 = vcombine.low %v3212_v14, %v3358_v36  ;;  %v3364_v40 = vcombine.high %v3212_v14, %v3358_v36  ;;  %v4429_v14 = vrot.slane %v4422_v5, %v6885_v32 }
 0xa5b   : > { %v3371_v43 = vrot.slane %v3363_v39, %v6885_v32  ;;  %v3378_v44 = vrot.slane %v3364_v40, %v6885_v32 }
 0xa5c   : > { %v3361_v41 = vpop.permute.xlu1 %3360 }
 0xa5d   : > { %v3379_v35 = vcombine.low %v3355_v37, %v3361_v41  ;;  %v3380_v42 = vcombine.high %v3355_v37, %v3361_v41 }
 0xa5f   : > { %v3387_v45 = vrot.slane %v3379_v35, %v6885_v32  ;;  %v3394_v46 = vrot.slane %v3380_v42, %v6885_v32 }
 0xa61   : > { %v3395_v49 = vcombine.low %v3371_v43, %v3387_v45  ;;  %v3396_v50 = vcombine.high %v3371_v43, %v3387_v45  ;;  %v3411_v52 = vcombine.low %v3378_v44, %v3394_v46  ;;  %v3412_v53 = vcombine.high %v3378_v44, %v3394_v46 }
 0xa63   : > { %v3403_v54 = vrot.slane %v3395_v49, %v6887_v38  ;;  %v3410_v55 = vrot.slane %v3396_v50, %v6887_v38  ;;  %v3419_v6 = vrot.slane %v3411_v52, %v6887_v38  ;;  %v3426_v8 = vrot.slane %v3412_v53, %v6887_v38 }
 0xa65   : > { %v3427_v56 = vcombine.high %v3403_v54, %v6658_v1  ;;  %v3428_v57 = vcombine.high %v3410_v55, %v6658_v1  ;;  %v3429_v58 = vcombine.high %v3419_v6, %v6658_v1  ;;  %v3430_v13 = vcombine.high %v3426_v8, %v6658_v1 }
 0xa66   : > { %v6229_v2 = vpack.c.bf16 %v3419_v6, %v3403_v54  ;;  %v6230_v51 = vpack.c.bf16 %v3426_v8, %v3410_v55 }
 0xa67   : > { %v6231_v17 = vpack.c.bf16 %v3429_v58, %v3427_v56  ;;  %v6232_v62 = vpack.c.bf16 %v3430_v13, %v3428_v57 }
 0xa68   : > { %v3790_v7 = vrot.slane %v6229_v2, %v6885_v32  ;;  %v3798_v9 = vrot.slane %v6230_v51, %v6885_v32 }
 0xa69   : > { %v3815_v48 = vrot.slane %v6231_v17, %v6885_v32  ;;  %v3823_v3 = vrot.slane %v6232_v62, %v6885_v32 }
 0xa6a   : > { %v4373_v59 = vpop.trf.xlu0  ;;  %v3799_v16 = vcombine.low %v3790_v7, %v3798_v9 }
 0xa6b   : > { %v4405_v61 = vcombine.low %v4309_v27, %v4373_v59  ;;  %v3824_v0 = vcombine.low %v3815_v48, %v3823_v3 }
 0xa6c   : > { %v3806_v23 = vrot.slane %v3799_v16, %v6887_v38 }
 0xa6d   : > { %v4412_v63 = vrot.slane %v4405_v61, %v6885_v32  ;;  %v3831_v20 = vrot.slane %v3824_v0, %v6887_v38 }
 0xa6e   : > { %v3836_v35 = vshrl.u32 %v3806_v23, 16  ;;  %v3807_v46 = vcombine.high %v3806_v23, %v6665_v29 }
 0xa6f   : > { %v4413_v4 = vcombine.low %v4404_v47, %v4412_v63  ;;  %v3835_v41 = vpack.i.b16 %v3831_v20, %v3806_v23  ;;  %v3832_v45 = vcombine.high %v3831_v20, %v6665_v29 }
 0xa70   : > { %v3842_v8 = vshrl.u32 %v3807_v46, 16 }
 0xa71   : > { %v4420_v12 = vrot.slane %v4413_v4, %v6887_v38  ;;  %v3843_v55 = vshrl.u32 %v3832_v45, 16  ;;  %v3841_v6 = vpack.i.b16 %v3832_v45, %v3807_v46 }
 0xa73   : > { %v4389_v10 = vpop.trf.xlu1  ;;  %v4421_v21 = vcombine.high %v4420_v12, %v6665_v29  ;;  %v4450_v27 = vshrl.u32 %v4420_v12, 16 }
 0xa74   : > { %v4430_v11 = vcombine.low %v4325_v31, %v4389_v10  ;;  %v3837_v31 = vshrl.u32 %v3831_v20, 16 }
 0xa75   : > { %v4456_v33 = vshrl.u32 %v4421_v21, 16 }
 0xa76   : > { %v4437_v15 = vrot.slane %v4430_v11, %v6885_v32  ;;  %v3838_v44 = vpack.i.b16 %v3837_v31, %v3836_v35 }
 0xa78   : > { %v4438_v19 = vcombine.low %v4429_v14, %v4437_v15 }
 0xa7a   : > { %v4445_v22 = vrot.slane %v4438_v19, %v6887_v38 }
 0xa7c   : > { %v4449_v24 = vpack.i.b16 %v4445_v22, %v4420_v12  ;;  %v4451_v28 = vshrl.u32 %v4445_v22, 16  ;;  %v4446_v30 = vcombine.high %v4445_v22, %v6665_v29 }
 0xa7e   : > { %v4463_v34 = vsel %vm1931_vm2, %v4449_v24, 0  ;;  %v4452_v36 = vpack.i.b16 %v4451_v28, %v4450_v27  ;;  %v4455_v37 = vpack.i.b16 %v4446_v30, %v4421_v21  ;;  %v4457_v39 = vshrl.u32 %v4446_v30, 16 }
 0xa7f   : > { %6434 = vmatpush3.bf16.msra.mxu1 %v4463_v34  ;;  %v3614_v54 = vpop.permute.xlu0 %3613 }
 0xa80   : > { %v4509_v40 = vsel %vm1931_vm2, %v4452_v36, 0  ;;  %6445 = vmatprep.subr.bf16.mxu1 %v6658_v1  ;;  %v4458_v42 = vpack.i.b16 %v4457_v39, %v4456_v33  ;;  %v4555_v43 = vsel %vm1931_vm2, %v4455_v37, 0 }
 0xa81   : > { %6440 = vmatpush3.bf16.msra.mxu0 %v4509_v40 }
 0xa82   : > { %6436 = vmatmul.mubr.msk.bf16.vlgmr.msra.gmra.mrb[28].mxu1 %vm1927_vm3, %v3835_v41  ;;  %6451 = vmatprep.subr.bf16.mxu0 %v6658_v1  ;;  %v4601_v50 = vsel %vm1931_vm2, %v4458_v42, 0 }
 0xa83   : > { %6446 = vmatpush3.bf16.msra.mxu1 %v4555_v43  ;;  %6447 = vmatprep.mubr.msk.bf16.mxu1 %vm6659_vm0, %v6658_v1  ;;  %v3620_v49 = vpop.permute.xlu1 %3619  ;;  %v3622_v45 = vpop.permute.xlu0 %3621 }
 0xa84   : > { %6442 = vmatmul.mubr.msk.bf16.vlgmr.msra.gmra.mrb[32].mxu0 %vm1927_vm3, %v3838_v44  ;;  %v3631_v52 = vcombine.low %v7190_v25, %v3620_v49  ;;  %v3632_v53 = vcombine.high %v7190_v25, %v3620_v49  ;;  %6457 = vmatprep.subr.bf16.mxu1 %v6658_v1  ;;  %v3844_v25 = vpack.i.b16 %v3843_v55, %v3842_v8 }
 0xa85   : > { %6452 = vmatpush3.bf16.msra.mxu0 %v4601_v50  ;;  %6453 = vmatprep.mubr.msk.bf16.mxu0 %vm6659_vm0, %v6658_v1  ;;  %v3699_v50 = vcombine.low %v7194_v26, %v3622_v45 }
 0xa86   : > { %6463 = vmatprep.subr.bf16.mxu0 %v6658_v1  ;;  %v3639_v57 = vrot.slane %v3631_v52, %v6885_v32  ;;  %v3646_v58 = vrot.slane %v3632_v53, %v6885_v32 }
 0xa87   : > { %v3626_v56 = vpop.permute.xlu1 %3625  ;;  %v3628_v46 = vpop.permute.xlu0 %3627  ;;  %v3707_v53 = vrot.slane %v3699_v50, %v6885_v32 }
 0xa88   : > { %v3647_v13 = vcombine.low %v3614_v54, %v3626_v56  ;;  %v3648_v59 = vcombine.high %v3614_v54, %v3626_v56 }
 0xa8a   : > { %6448 = vmatmul.mubr.msk.bf16.vlgmr.msra.gmra.mrb[32].mxu1 %vm1927_vm3, %v3841_v6  ;;  %v3655_v60 = vrot.slane %v3647_v13, %v6885_v32  ;;  %v3662_v61 = vrot.slane %v3648_v59, %v6885_v32 }
 0xa8b   : > { %6459 = vmatprep.mubr.msk.bf16.mxu1 %vm6659_vm0, %v6658_v1  ;;  %v3616_v49 = vpop.permute.xlu1 %3615 }
 0xa8c   : > { %6454 = vmatmul.mubr.msk.bf16.vlgmr.msra.gmra.mrb[36].mxu0 %vm1927_vm3, %v3844_v25  ;;  %v3663_v17 = vcombine.low %v3639_v57, %v3655_v60  ;;  %v3664_v62 = vcombine.high %v3639_v57, %v3655_v60  ;;  %v3679_v63 = vcombine.low %v3646_v58, %v3662_v61  ;;  %v3680_v47 = vcombine.high %v3646_v58, %v3662_v61 }
 0xa8d   : > { %6465 = vmatprep.mubr.msk.bf16.mxu0 %vm6659_vm0, %v6658_v1  ;;  %v3715_v52 = vcombine.low %v3616_v49, %v3628_v46  ;;  %v3700_v60 = vcombine.high %v7194_v26, %v3622_v45  ;;  %v3716_v61 = vcombine.high %v3616_v49, %v3628_v46 }
 0xa8e   : > { %v3678_v2 = vrot.slane %v3664_v62, %v6887_v38  ;;  %v3671_v51 = vrot.slane %v3663_v17, %v6887_v38  ;;  %v3687_v48 = vrot.slane %v3679_v63, %v6887_v38  ;;  %v3694_v7 = vrot.slane %v3680_v47, %v6887_v38 }
 0xa8f   : > { %v3723_v54 = vrot.slane %v3715_v52, %v6885_v32  ;;  %v3714_v17 = vrot.slane %v3700_v60, %v6885_v32  ;;  %v3730_v62 = vrot.slane %v3716_v61, %v6885_v32 }
 0xa90   : > { %v3769_v3 = vpack.c.bf16 %v3678_v2, %v3678_v2  ;;  %v3767_v4 = vpack.c.bf16 %v3671_v51, %v3671_v51  ;;  %v3696_v5 = vcombine.high %v3678_v2, %v6658_v1  ;;  %v3771_v9 = vpack.c.bf16 %v3687_v48, %v3687_v48 }
 0xa91   : > { %v3697_v11 = vcombine.high %v3687_v48, %v6658_v1  ;;  %v3773_v0 = vpack.c.bf16 %v3694_v7, %v3694_v7  ;;  %v3695_v14 = vcombine.high %v3671_v51, %v6658_v1  ;;  %v3698_v15 = vcombine.high %v3694_v7, %v6658_v1 }
 0xa92   : > { %4727 = vxpose.xlu0.c.b16.start.end [1/1] (short) (narrow) %v3769_v3, 16  ;;  %4695 = vxpose.xlu1.c.b16.start.end [1/1] (short) (narrow) %v3767_v4, 16  ;;  %v3770_v10 = vpack.c.bf16 %v3696_v5, %v3696_v5  ;;  %v3731_v55 = vcombine.low %v3707_v53, %v3723_v54  ;;  %v3732_v63 = vcombine.high %v3707_v53, %v3723_v54 }
 0xa93   : > { %v3772_v12 = vpack.c.bf16 %v3697_v11, %v3697_v11  ;;  %v3768_v16 = vpack.c.bf16 %v3695_v14, %v3695_v14  ;;  %v3774_v19 = vpack.c.bf16 %v3698_v15, %v3698_v15  ;;  %v3747_v2 = vcombine.low %v3714_v17, %v3730_v62 }
 0xa94   : > { %v3739_v6 = vrot.slane %v3731_v55, %v6887_v38  ;;  %v3746_v47 = vrot.slane %v3732_v63, %v6887_v38  ;;  %v3748_v51 = vcombine.high %v3714_v17, %v3730_v62 }
 0xa95   : > { %v3755_v3 = vrot.slane %v3747_v2, %v6887_v38 }
 0xa96   : > { %4759 = vxpose.xlu0.c.b16.start.end [1/1] (short) (narrow) %v3771_v9, 16  ;;  %4743 = vxpose.xlu1.c.b16.start.end [1/1] (short) (narrow) %v3770_v10, 16  ;;  %v3763_v8 = vcombine.high %v3739_v6, %v6658_v1  ;;  %v3775_v56 = vpack.c.bf16 %v3739_v6, %v3739_v6  ;;  %v3764_v48 = vcombine.high %v3746_v47, %v6658_v1 }
 0xa97   : > { %v3777_v4 = vpack.c.bf16 %v3746_v47, %v3746_v47  ;;  %v3765_v7 = vcombine.high %v3755_v3, %v6658_v1  ;;  %v3762_v26 = vrot.slane %v3748_v51, %v6887_v38  ;;  %v3779_v9 = vpack.c.bf16 %v3755_v3, %v3755_v3 }
 0xa98   : > { %v3776_v57 = vpack.c.bf16 %v3763_v8, %v3763_v8  ;;  %v3778_v5 = vpack.c.bf16 %v3764_v48, %v3764_v48 }
 0xa99   : > { %v3780_v10 = vpack.c.bf16 %v3765_v7, %v3765_v7  ;;  %v3766_v11 = vcombine.high %v3762_v26, %v6658_v1 }
 0xa9a   : > { %4791 = vxpose.xlu0.c.b16.start.end [1/1] (short) (narrow) %v3773_v0, 16  ;;  %4775 = vxpose.xlu1.c.b16.start.end [1/1] (short) (narrow) %v3772_v12, 16  ;;  %v3781_v0 = vpack.c.bf16 %v3762_v26, %v3762_v26 }
 0xa9b   : > { %v3782_v12 = vpack.c.bf16 %v3766_v11, %v3766_v11 }
 0xa9e   : > { %4711 = vxpose.xlu0.c.b16.start.end [1/1] (short) (narrow) %v3768_v16, 16  ;;  %4807 = vxpose.xlu1.c.b16.start.end [1/1] (short) (narrow) %v3774_v19, 16 }
 0xaf8   : > { %v4735_v14 = vpop.trf.xlu0  ;;  %v4703_v15 = vpop.trf.xlu1 }
 0xafc   : > { %v4767_v16 = vpop.trf.xlu0  ;;  %v4751_v19 = vpop.trf.xlu1 }
 0xb55   : > { %v4499_v20 = vpop.f32.mrb[28].mxu1 }
 0xb56   : > { %v7268_v21 = vmul.f32 0.35355338, %v4499_v20  ;;  %v6437_v22 = vpop.f32.mrb[29].mxu1  ;;  %v4799_v20 = vpop.trf.xlu0 }
 0xb57   : > { %v4502_v23 = vpop.f32.mrb[30].mxu1  ;;  %v4545_v24 = vpop.f32.mrb[32].mxu0 }
 0xb58   : > { %v7270_v27 = vmul.f32 0.35355338, %v4545_v24  ;;  %v6438_v28 = vpop.f32.mrb[31].mxu1  ;;  %v6443_v30 = vpop.f32.mrb[33].mxu0  ;;  %v4647_v31 = vsel %vm3044_vm4, %v7268_v21, -inf }
 0xb59   : > { %4648 = vmax.xlane.f32.xlu0 %v4647_v31  ;;  %v4548_v33 = vpop.f32.mrb[34].mxu0  ;;  %v4783_v22 = vpop.trf.xlu1 }
 0xb5a   : > { %v6444_v34 = vpop.f32.mrb[35].mxu0  ;;  %v4650_v36 = vsel %vm3044_vm4, %v7270_v27, -inf  ;;  %v4719_v23 = vpop.trf.xlu0 }
 0xb5b   : > { %4651 = vmax.xlane.f32.xlu1 %v4650_v36 }
 0xb5d   : > { %v4591_v37 = vpop.f32.mrb[32].mxu1  ;;  %v4815_v24 = vpop.trf.xlu1 }
 0xb5e   : > { %v6449_v39 = vpop.f32.mrb[33].mxu1  ;;  %v7281_v58 = vmul.f32 0.35355338, %v4591_v37 }
 0xb5f   : > { %v4594_v40 = vpop.f32.mrb[34].mxu1  ;;  %v4637_v41 = vpop.f32.mrb[36].mxu0 }
 0xb60   : > { %v6450_v35 = vpop.f32.mrb[35].mxu1  ;;  %v6455_v42 = vpop.f32.mrb[37].mxu0  ;;  %v7283_v13 = vmul.f32 0.35355338, %v4637_v41  ;;  %v4653_v59 = vsel %vm3044_vm4, %v7281_v58, -inf  ;;  %v4951_v40 = vcombine.low %v4703_v15, %v4767_v16  ;;  %v4959_v41 = vcombine.low %v4735_v14, %v4799_v20 }
 0xb61   : > { %v4640_v43 = vpop.f32.mrb[38].mxu0  ;;  %v5019_v42 = vcombine.low %v4719_v23, %v4783_v22 }
 0xb62   : > { %v6456_v44 = vpop.f32.mrb[39].mxu0  ;;  %v4656_v25 = vsel %vm3044_vm4, %v7283_v13, -inf  ;;  %v5027_v43 = vcombine.low %v4751_v19, %v4815_v24  ;;  %v4958_v45 = vrot.slane %v4951_v40, %v6885_v32  ;;  %v4966_v46 = vrot.slane %v4959_v41, %v6885_v32 }
 0xb63   : > { %v5026_v52 = vrot.slane %v5019_v42, %v6885_v32 }
 0xb64   : > { %v5034_v53 = vrot.slane %v5027_v43, %v6885_v32  ;;  %v4983_v8 = vcombine.low %v4958_v45, %v4966_v46  ;;  %v4984_v7 = vcombine.high %v4958_v45, %v4966_v46 }
 0xb66   : > { %v4991_v62 = vrot.slane %v4983_v8, %v6887_v38  ;;  %v5052_v51 = vcombine.high %v5026_v52, %v5034_v53  ;;  %v4998_v20 = vrot.slane %v4984_v7, %v6887_v38 }
 0xb68   : > { %v5066_v11 = vrot.slane %v5052_v51, %v6887_v38 }
 0xb86   : > { %4823 = vxpose.xlu0.c.b16.start.end [1/1] (short) (narrow) %v3775_v56, 16 }
 0xb88   : > { %4839 = vxpose.xlu1.c.b16.start.end [1/1] (short) (narrow) %v3776_v57, 16 }
 0xb93   : > { %4654 = vmax.xlane.f32.xlu0 %v4653_v59 }
 0xb95   : > { %4657 = vmax.xlane.f32.xlu1 %v4656_v25  ;;  %v5051_v25 = vcombine.low %v5026_v52, %v5034_v53 }
 0xb97   : > { %v5059_v3 = vrot.slane %v5051_v25, %v6887_v38 }
 0xbc0   : > { %4855 = vxpose.xlu0.c.b16.start.end [1/1] (short) (narrow) %v3777_v4, 16 }
 0xbc2   : > { %4871 = vxpose.xlu1.c.b16.start.end [1/1] (short) (narrow) %v3778_v5, 16 }
 0xbc4   : > { %4887 = vxpose.xlu0.c.b16.start.end [1/1] (short) (narrow) %v3779_v9, 16 }
 0xbc6   : > { %4903 = vxpose.xlu1.c.b16.start.end [1/1] (short) (narrow) %v3780_v10, 16 }
 0xbc8   : > { %4919 = vxpose.xlu0.c.b16.start.end [1/1] (short) (narrow) %v3781_v0, 16 }
 0xbca   : > { %4935 = vxpose.xlu1.c.b16.start.end [1/1] (short) (narrow) %v3782_v12, 16 }
 0xbe6   : > { %v4649_v28 = vpop.xlane.xlu0 %4648 }
 0xbe7   : > { %v4659_v19 = vsub.f32 %v7268_v21, %v4649_v28 }
 0xbe8   : > { %v7298_v30 = vpop.xlane.xlu1 %4651 }
 0xbe9   : > { %v4663_v40 = vmul.f32 1.442695, %v4659_v19 }
 0xbeb   : > { %6598 = vpow2.f32 %v4663_v40 }
 0xbec   : > { %v4831_v31 = vpop.trf.xlu0 }
 0xbee   : > { %v4847_v33 = vpop.trf.xlu1 }
 0xc20   : > { %v7300_v34 = vpop.xlane.xlu0 %4654 }
 0xc21   : > { %v4661_v41 = vsub.f32 %v7281_v58, %v7300_v34  ;;  %v6599_v58 = vpop.eup %6598 }
 0xc22   : > { %v7302_v36 = vpop.xlane.xlu1 %4657  ;;  %v4671_v46 = vsel %vm3044_vm4, %v6599_v58, 0.0 }
 0xc23   : > { %v4662_v42 = vsub.f32 %v7283_v13, %v7302_v36 }
 0xc25   : > { %v4669_v45 = vmul.f32 1.442695, %v4662_v42 }
 0xc26   : > { %v4863_v37 = vpop.trf.xlu0 }
 0xc28   : > { %v4879_v39 = vpop.trf.xlu1 }
 0xc2a   : > { %v4895_v35 = vpop.trf.xlu0 }
 0xc2b   : > { %v4967_v49 = vcombine.low %v4831_v31, %v4895_v35  ;;  %v4660_v31 = vsub.f32 %v7270_v27, %v7298_v30  ;;  %v4667_v27 = vmul.f32 1.442695, %v4661_v41 }
 0xc2c   : > { %v4911_v44 = vpop.trf.xlu1 }
 0xc2d   : > { %v5035_v54 = vcombine.low %v4847_v33, %v4911_v44  ;;  %v4974_v56 = vrot.slane %v4967_v49, %v6885_v32  ;;  %v4665_v28 = vmul.f32 1.442695, %v4660_v31 }
 0xc2e   : > { %v4927_v50 = vpop.trf.xlu0 }
 0xc2f   : > { %v4975_v55 = vcombine.low %v4863_v37, %v4927_v50  ;;  %v5042_v60 = vrot.slane %v5035_v54, %v6885_v32  ;;  %6600 = vpow2.f32 %v4665_v28 }
 0xc30   : > { %v4943_v6 = vpop.trf.xlu1  ;;  %6602 = vpow2.f32 %v4667_v27 }
 0xc31   : > { %v4982_v57 = vrot.slane %v4975_v55, %v6885_v32  ;;  %v5043_v59 = vcombine.low %v4879_v39, %v4943_v6  ;;  %6604 = vpow2.f32 %v4669_v45 }
 0xc33   : > { %v4999_v61 = vcombine.low %v4974_v56, %v4982_v57  ;;  %v5050_v17 = vrot.slane %v5043_v59, %v6885_v32  ;;  %v5000_v48 = vcombine.high %v4974_v56, %v4982_v57 }
 0xc35   : > { %v5007_v63 = vrot.slane %v4999_v61, %v6887_v38  ;;  %v5067_v47 = vcombine.low %v5042_v60, %v5050_v17  ;;  %v5068_v2 = vcombine.high %v5042_v60, %v5050_v17  ;;  %v5014_v0 = vrot.slane %v5000_v48, %v6887_v38 }
 0xc37   : > { %v5075_v4 = vrot.slane %v5067_v47, %v6887_v38  ;;  %v5015_v5 = vcombine.low %v4991_v62, %v5007_v63  ;;  %v5082_v26 = vrot.slane %v5068_v2, %v6887_v38  ;;  %v5016_v16 = vcombine.high %v4991_v62, %v5007_v63 }
 0xc38   : > { %v5017_v39 = vcombine.low %v4998_v20, %v5014_v0  ;;  %v5018_v54 = vcombine.high %v4998_v20, %v5014_v0 }
 0xc39   : > { %v5083_v9 = vcombine.low %v5059_v3, %v5075_v4  ;;  %v5084_v10 = vcombine.high %v5059_v3, %v5075_v4  ;;  %v5091_v14 = vshrl.u32 %v5015_v5, 16  ;;  %v5085_v24 = vcombine.low %v5066_v11, %v5082_v26  ;;  %v6601_v34 = vpop.eup %6600 }
 0xc3a   : > { %v5099_v37 = vshrl.u32 %v5016_v16, 16  ;;  %v5107_v44 = vshrl.u32 %v5017_v39, 16  ;;  %v6603_v49 = vpop.eup %6602  ;;  %v4674_v13 = vsel %vm3044_vm4, %v6601_v34, 0.0  ;;  %v5086_v53 = vcombine.high %v5066_v11, %v5082_v26 }
 0xc3b   : > { %v5089_v12 = vpack.i.b16 %v5083_v9, %v5015_v5  ;;  %v5092_v15 = vshrl.u32 %v5083_v9, 16  ;;  %v5100_v23 = vshrl.u32 %v5084_v10, 16  ;;  %v5097_v33 = vpack.i.b16 %v5084_v10, %v5016_v16  ;;  %v6605_v36 = vpop.eup %6604 }
 0xc3c   : > { %v5108_v21 = vshrl.u32 %v5085_v24, 16  ;;  %v5105_v43 = vpack.i.b16 %v5085_v24, %v5017_v39  ;;  %v4677_v50 = vsel %vm3044_vm4, %v6603_v49, 0.0  ;;  %v4680_v52 = vsel %vm3044_vm4, %v6605_v36, 0.0 }
 0xc3d   : > { %5119 = vxpose.xlu0.c.b16.start.end [1/1] (short) (narrow) %v5089_v12, 16  ;;  %v5093_v22 = vpack.i.b16 %v5092_v15, %v5091_v14  ;;  %v5101_v35 = vpack.i.b16 %v5100_v23, %v5099_v37  ;;  %v5116_v55 = vshrl.u32 %v5086_v53, 16  ;;  %v5113_v6 = vpack.i.b16 %v5086_v53, %v5018_v54 }
 0xc3e   : > { %v5109_v30 = vpack.i.b16 %v5108_v21, %v5107_v44  ;;  %v5115_v8 = vshrl.u32 %v5018_v54, 16 }
 0xc3f   : > { %5135 = vxpose.xlu1.c.b16.start.end [1/1] (short) (narrow) %v5093_v22, 16 }
 0xc40   : > { %v5117_v56 = vpack.i.b16 %v5116_v55, %v5115_v8 }
 0xc41   : > { %5151 = vxpose.xlu0.c.b16.start.end [1/1] (short) (narrow) %v5097_v33, 16 }
 0xc43   : > { %5167 = vxpose.xlu1.c.b16.start.end [1/1] (short) (narrow) %v5101_v35, 16 }
 0xc45   : > { %5183 = vxpose.xlu0.c.b16.start.end [1/1] (short) (narrow) %v5105_v43, 16 }
 0xc47   : > { %5199 = vxpose.xlu1.c.b16.start.end [1/1] (short) (narrow) %v5109_v30, 16 }
 0xc52   : > { %4672 = vadd.xlane.f32.xlu0 %v4671_v46 }
 0xc54   : > { %4675 = vadd.xlane.f32.xlu1 %v4674_v13 }
 0xc56   : > { %4678 = vadd.xlane.f32.xlu0 %v4677_v50 }
 0xc58   : > { %4681 = vadd.xlane.f32.xlu1 %v4680_v52 }
 0xc83   : > { %5215 = vxpose.xlu0.c.b16.start.end [1/1] (short) (narrow) %v5113_v6, 16 }
 0xc85   : > { %5231 = vxpose.xlu1.c.b16.start.end [1/1] (short) (narrow) %v5117_v56, 16 }
 0xca3   : > { %v5127_v57 = vpop.trf.xlu0 }
 0xca5   : > { %v5143_v59 = vpop.trf.xlu1 }
 0xca7   : > { %v5159_v25 = vpop.trf.xlu0 }
 0xca9   : > { %v5175_v60 = vpop.trf.xlu1 }
 0xcab   : > { %v5191_v61 = vpop.trf.xlu0 }
 0xcac   : > { %v5247_v51 = vcombine.low %v5127_v57, %v5191_v61 }
 0xcad   : > { %v5207_v17 = vpop.trf.xlu1 }
 0xcae   : > { %v5272_v4 = vcombine.low %v5143_v59, %v5207_v17  ;;  %v5254_v10 = vrot.slane %v5247_v51, %v6885_v32 }
 0xcb0   : > { %v5279_v16 = vrot.slane %v5272_v4, %v6885_v32 }
 0xcdf   : > { %v4673_v62 = vpop.xlane.xlu0 %4672 }
 0xce0   : > { %6606 = vrcp.f32 %v4673_v62 }
 0xce1   : > { %v4676_v63 = vpop.xlane.xlu1 %4675 }
 0xce2   : > { %6608 = vrcp.f32 %v4676_v63 }
 0xce3   : > { %v4679_v47 = vpop.xlane.xlu0 %4678 }
 0xce4   : > { %6610 = vrcp.f32 %v4679_v47 }
 0xce5   : > { %v4682_v2 = vpop.xlane.xlu1 %4681 }
 0xce6   : > { %6612 = vrcp.f32 %v4682_v2 }
 0xce9   : > { %v5223_v48 = vpop.trf.xlu0 }
 0xcea   : > { %v6607_v3 = vpop.eup %6606  ;;  %v5255_v5 = vcombine.low %v5159_v25, %v5223_v48 }
 0xceb   : > { %v5239_v7 = vpop.trf.xlu1  ;;  %v4687_v26 = vmul.f32 %v6607_v3, %v6599_v58 }
 0xcec   : > { %v6609_v9 = vpop.eup %6608  ;;  %v5262_v11 = vrot.slane %v5255_v5, %v6885_v32  ;;  %v5280_v0 = vcombine.low %v5175_v60, %v5239_v7 }
 0xced   : > { %v4691_v12 = vpack.c.bf16 %v4687_v26, %v4687_v26  ;;  %v4688_v14 = vmul.f32 %v6609_v9, %v6601_v34 }
 0xcee   : > { %v6611_v15 = vpop.eup %6610  ;;  %v5263_v19 = vcombine.low %v5254_v10, %v5262_v11  ;;  %v5287_v20 = vrot.slane %v5280_v0, %v6885_v32 }
 0xcef   : > { %v5313_v22 = vsel %vm3044_vm4, %v4691_v12, 0  ;;  %v4692_v23 = vpack.c.bf16 %v4688_v14, %v4688_v14  ;;  %v4689_v24 = vmul.f32 %v6611_v15, %v6603_v49  ;;  %v6572_v14 = vld [vmem:[%s7446_s26] sm:$0xff]  }
 0xcf0   : > { %v6613_v31 = vpop.eup %6612  ;;  %v5270_v33 = vrot.slane %v5263_v19, %v6887_v38  ;;  %v5288_v37 = vcombine.low %v5279_v16, %v5287_v20  ;;  %6458 = vmatpush3.bf16.xpose.msra.mxu1 %v5313_v22 }
 0xcf1   : > { %v5359_v39 = vsel %vm3044_vm4, %v4692_v23, 0  ;;  %6469 = vmatprep.subr.bf16.mxu1 %v6658_v1  ;;  %v4690_v40 = vmul.f32 %v6613_v31, %v6605_v36  ;;  %v4693_v35 = vpack.c.bf16 %v4689_v24, %v4689_v24 }
 0xcf2   : > { %v5295_v41 = vrot.slane %v5288_v37, %v6887_v38  ;;  %6464 = vmatpush3.bf16.xpose.msra.mxu0 %v5359_v39  ;;  %v5300_v21 = vshrl.u32 %v5270_v33, 16  ;;  %v5271_v45 = vcombine.high %v5270_v33, %v6665_v29 }
 0xcf3   : > { %6475 = vmatprep.subr.bf16.mxu0 %v6658_v1  ;;  %v4694_v43 = vpack.c.bf16 %v4690_v40, %v4690_v40  ;;  %v5405_v30 = vsel %vm3044_vm4, %v4693_v35, 0 }
 0xcf4   : > { %v5299_v28 = vpack.i.b16 %v5295_v41, %v5270_v33  ;;  %v5301_v42 = vshrl.u32 %v5295_v41, 16  ;;  %v5296_v27 = vcombine.high %v5295_v41, %v6665_v29  ;;  %v5306_v46 = vshrl.u32 %v5271_v45, 16  ;;  %v6573_v41 = vld [vmem:[%s7446_s26 + $0x8] sm:$0xff]  }
 0xcf5   : > { %v5451_v58 = vsel %vm3044_vm4, %v4694_v43, 0 }
 0xcf6   : > { %v5302_v44 = vpack.i.b16 %v5301_v42, %v5300_v21  ;;  %v5307_v34 = vshrl.u32 %v5296_v27, 16  ;;  %v5305_v49 = vpack.i.b16 %v5296_v27, %v5271_v45 }
 0xcf7   : > { %6460 = vmatmul.mubr.msk.bf16.vlgmr.msra.gmra.mrb[36].mxu1 %vm3044_vm4, %v5299_v28 }
 0xcf8   : > { %6470 = vmatpush3.bf16.xpose.msra.mxu1 %v5405_v30  ;;  %6471 = vmatprep.mubr.msk.bf16.mxu1 %vm6659_vm0, %v6658_v1  ;;  %v5308_v13 = vpack.i.b16 %v5307_v34, %v5306_v46 }
 0xcf9   : > { %6466 = vmatmul.mubr.msk.bf16.vlgmr.msra.gmra.mrb[40].mxu0 %vm3044_vm4, %v5302_v44  ;;  %6481 = vmatprep.subr.bf16.mxu1 %v6658_v1 }
 0xcfa   : > { %6476 = vmatpush3.bf16.xpose.msra.mxu0 %v5451_v58  ;;  %6477 = vmatprep.mubr.msk.bf16.mxu0 %vm6659_vm0, %v6658_v1 }
 0xcfb   : > { %6489 = vmatprep.subr.bf16.mxu0 %v6658_v1 }
 0xcff   : > { %6472 = vmatmul.mubr.msk.bf16.vlgmr.msra.gmra.mrb[40].mxu1 %vm3044_vm4, %v5305_v49 }
 0xd00   : > { %6485 = vmatprep.mubr.msk.bf16.mxu1 %vm6659_vm0, %v6658_v1  ;;  %6482 = vmatpush3.bf16.msra.mxu1 %v6572_v14  ;;  %v6249_v14 = vld [vmem:[%s7451_s18] ss:$0 sm:$0xff] }
 0xd01   : > { %6478 = vmatmul.mubr.msk.bf16.vlgmr.msra.gmra.mrb[44].mxu0 %vm3044_vm4, %v5308_v13  ;;  %6483 = vmatprep.subr.bf16.mxu1 %v6658_v1 }
 0xd02   : > { %6493 = vmatprep.mubr.msk.bf16.mxu0 %vm6659_vm0, %v6658_v1 }
 0xd04   : > { %6484 = vmatpush3.bf16.msra.mxu1 %v6573_v41 }
 0xd05   : > { %6497 = vmatprep.subr.bf16.mxu1 %v6658_v1 }
 0xdca   : > { %v5349_v29 = vpop.f32.mrb[36].mxu1 }
 0xdcb   : > { %5493 = vxpose.xlu0.b32.start.end [1/1] (short) (narrow) %v5349_v29, 8  ;;  %v6461_v36 = vpop.f32.mrb[37].mxu1 }
 0xdcc   : > { %v5352_v50 = vpop.f32.mrb[38].mxu1  ;;  %v5395_v52 = vpop.f32.mrb[40].mxu0 }
 0xdcd   : > { %v6462_v53 = vpop.f32.mrb[39].mxu1  ;;  %5525 = vxpose.xlu1.b32.start.end [1/1] (short) (narrow) %v5395_v52, 8  ;;  %v6467_v54 = vpop.f32.mrb[41].mxu0  ;;  %v6243_v52 = vld [vmem:[%s7447_s28] ss:$0 sm:$0xff] }
 0xdce   : > { %v5398_v55 = vpop.f32.mrb[42].mxu0 }
 0xdcf   : > { %v6468_v6 = vpop.f32.mrb[43].mxu0  ;;  %v5839_v55 = vadd.f32 %v7137_v18, %v7137_v18 }
 0xdd2   : > { %v5441_v8 = vpop.f32.mrb[40].mxu1 }
 0xdd3   : > { %5557 = vxpose.xlu0.b32.start.end [1/1] (short) (narrow) %v5441_v8, 8  ;;  %v6473_v56 = vpop.f32.mrb[41].mxu1 }
 0xdd4   : > { %v5444_v57 = vpop.f32.mrb[42].mxu1  ;;  %v5487_v59 = vpop.f32.mrb[44].mxu0 }
 0xdd5   : > { %v6474_v25 = vpop.f32.mrb[43].mxu1  ;;  %v6479_v60 = vpop.f32.mrb[45].mxu0 }
 0xdd6   : > { %v5490_v61 = vpop.f32.mrb[46].mxu0 }
 0xdd7   : > { %5589 = vxpose.xlu0.b32.start.end [1/1] (short) (narrow) %v5487_v59, 8  ;;  %v6480_v17 = vpop.f32.mrb[47].mxu0 }
 0xe4b   : > { %v5509_v62 = vpop.trf.xlu0 }
 0xe4d   : > { %v5541_v47 = vpop.trf.xlu1 }
 0xe53   : > { %v5573_v63 = vpop.trf.xlu0 }
 0xe54   : > { %v5621_v2 = vcombine.low %v5509_v62, %v5573_v63  ;;  %v5622_v51 = vcombine.high %v5509_v62, %v5573_v63 }
 0xe56   : > { %v5629_v5 = vrot.slane %v5621_v2, %v6885_v32  ;;  %v5636_v7 = vrot.slane %v5622_v51, %v6885_v32 }
 0xe57   : > { %v5605_v48 = vpop.trf.xlu0 }
 0xe58   : > { %v5637_v3 = vcombine.low %v5541_v47, %v5605_v48  ;;  %v5638_v4 = vcombine.high %v5541_v47, %v5605_v48 }
 0xe5a   : > { %v5645_v26 = vrot.slane %v5637_v3, %v6885_v32  ;;  %v5652_v9 = vrot.slane %v5638_v4, %v6885_v32 }
 0xe5c   : > { %v5653_v10 = vcombine.low %v5629_v5, %v5645_v26  ;;  %v5654_v11 = vcombine.high %v5629_v5, %v5645_v26  ;;  %v5669_v0 = vcombine.low %v5636_v7, %v5652_v9  ;;  %v5670_v12 = vcombine.high %v5636_v7, %v5652_v9  ;;  %v6248_v26 = vld [vmem:[%s6812_s20] ss:$0 sm:$0xff] }
 0xe5e   : > { %v5661_v15 = vrot.slane %v5653_v10, %v6887_v38  ;;  %v5668_v16 = vrot.slane %v5654_v11, %v6887_v38  ;;  %v5677_v19 = vrot.slane %v5669_v0, %v6887_v38  ;;  %v5684_v20 = vrot.slane %v5670_v12, %v6887_v38 }
 0xe60   : > { %v5689_v22 = vcombine.low %v5661_v15, %v5668_v16  ;;  %v6241_v23 = vcombine.high %v5661_v15, %v5668_v16  ;;  %v5705_v24 = vcombine.low %v5677_v19, %v5684_v20  ;;  %v6242_v31 = vcombine.high %v5677_v19, %v5684_v20 }
 0xe62   : > { %v5696_v33 = vrot.slane %v5689_v22, %v6885_v32  ;;  %v5704_v37 = vrot.slane %v6241_v23, %v6885_v32  ;;  %v5712_v39 = vrot.slane %v5705_v24, %v6885_v32  ;;  %v5720_v40 = vrot.slane %v6242_v31, %v6885_v32  ;;  %v6253_v31 = vld [vmem:[%s7452_s10] ss:$0 sm:$0xff] }
 0xe64   : > { %v5722_v35 = vcombine.high %v5696_v33, %v5704_v37  ;;  %v5738_v21 = vcombine.high %v5712_v39, %v5720_v40  ;;  %v5721_v28 = vcombine.low %v5696_v33, %v5704_v37  ;;  %v5737_v42 = vcombine.low %v5712_v39, %v5720_v40 }
 0xe66   : > { %v5736_v43 = vrot.slane %v5722_v35, %v6887_v38  ;;  %v5752_v44 = vrot.slane %v5738_v21, %v6887_v38  ;;  %v5729_v27 = vrot.slane %v5721_v28, %v6887_v38  ;;  %v5745_v30 = vrot.slane %v5737_v42, %v6887_v38 }
 0xe68   : > { %v5755_v45 = vcombine.low %v5736_v43, %v5752_v44  ;;  %v5754_v58 = vcombine.high %v5729_v27, %v5745_v30  ;;  %v5753_v32 = vcombine.low %v5729_v27, %v5745_v30  ;;  %v5756_v34 = vcombine.high %v5736_v43, %v5752_v44 }
 0xe6a   : > { %5762 = vrot.lane.b32.xlu0 %v5755_v45, %s6666_s1  ;;  %5758 = vrot.lane.b32.xlu1 %v5754_v58, %s6667_s2  ;;  %s7448_s1 = sld [smem:[#allocation8_spill]]  ;;  %s7449_s2 = sld [smem:[#allocation10_spill]] }
 0xe6e   : > { %5766 = vrot.lane.b32.xlu1 %v5756_v34, %s6668_s7  ;;  %s7450_s7 = sld [smem:[#allocation14_spill]]  ;;  %v6259_v34 = vld [vmem:[%s6817_s30] ss:$0 sm:$0xff] }
 0xe70   : > { %v6574_v63 = vld [vmem:[%s7448_s1] sm:$0xff]   ;;  %v6575_v18 = vld [vmem:[%s7448_s1 + $0x8] sm:$0xff]   ;;  %v6578_v0 = vld [vmem:[%s7449_s2 + $0x10] sm:$0xff]  }
 0xe71   : > { %6490 = vmatpush3.bf16.msra.mxu0 %v6574_v63  ;;  %v6576_v47 = vld [vmem:[%s7449_s2] sm:$0xff]   ;;  %v6577_v2 = vld [vmem:[%s7449_s2 + $0x8] sm:$0xff]   ;;  %v6579_v12 = vld [vmem:[%s7449_s2 + $0x18] sm:$0xff]  }
 0xe72   : > { %6491 = vmatprep.subr.bf16.mxu0 %v6658_v1 }
 0xe74   : > { %v6247_v5 = vld [vmem:[%s7450_s7] ss:$0 sm:$0xff] }
 0xe75   : > { %6492 = vmatpush3.bf16.msra.mxu0 %v6575_v18 }
 0xedc   : > { %v5759_v46 = vpop.permute.xlu1 %5758  ;;  %v5763_v49 = vpop.permute.xlu0 %5762 }
 0xedd   : > { %v5769_v13 = vsel %vm1927_vm3, %v5753_v32, %v5759_v46 }
 0xede   : > { %v5770_v36 = vsel %vm3044_vm4, %v5769_v13, %v5763_v49  ;;  %v6260_v49 = vld [vmem:[%s6822_s4] ss:$0 sm:$0xff] }
 0xee0   : > { %v5767_v29 = vpop.permute.xlu1 %5766 }
 0xee1   : > { %v5771_v38 = vsel %vm3046_vm5, %v5770_v36, %v5767_v29 }
 0xee2   : > { %v5772_v50 = vpack.c.bf16 %v5771_v38, %v5771_v38 }
 0xee4   : > { %6486 = vmatmul.mubr.msk.bf16.vlgmr.msra.gmra.mrb[44].mxu1 %vm1015_vm1, %v5772_v50 }
 0xee5   : > { %6505 = vmatprep.mubr.msk.bf16.mxu1 %vm6659_vm0, %v6658_v1  ;;  %6498 = vmatpush3.bf16.msra.mxu1 %v6576_v47 }
 0xee6   : > { %6499 = vmatprep.subr.bf16.mxu1 %v6658_v1 }
 0xee9   : > { %6500 = vmatpush3.bf16.msra.mxu1 %v6577_v2 }
 0xeea   : > { %6501 = vmatprep.subr.bf16.mxu1 %v6658_v1 }
 0xeed   : > { %6502 = vmatpush3.bf16.msra.mxu1 %v6578_v0 }
 0xeee   : > { %6503 = vmatprep.subr.bf16.mxu1 %v6658_v1 }
 0xef1   : > { %6504 = vmatpush3.bf16.msra.mxu1 %v6579_v12 }
 0xfb7   : > { %v5833_v53 = vpop.f32.mrb[44].mxu1 }
 0xfb8   : > { %v5834_v54 = vadd.f32 %v6243_v52, %v5833_v53  ;;  %v6487_v6 = vpop.f32.mrb[45].mxu1 }
 0xfb9   : > { %v5836_v8 = vpop.f32.mrb[46].mxu1 }
 0xfba   : > { %v5840_v56 = vadd.f32 %v5839_v55, %v5834_v54  ;;  %v6488_v57 = vpop.f32.mrb[47].mxu1 }
 0xfbc   : > { %v5841_v59 = vsel %vm1015_vm1, %v5840_v56, 0.0 }
 0xfbd   : > { %5842 = vadd.xlane.f32.xlu1 %v5841_v59 }
0x104a   : > { %v5843_v25 = vpop.xlane.xlu1 %5842 }
0x104b   : > { %v5844_v60 = vmul.f32 0.03125, %v5843_v25 }
0x104d   : > { %v5845_v61 = vsub.f32 %v5840_v56, %v5844_v60 }
0x104f   : > { %v5846_v17 = vmul.f32 %v5845_v61, %v5845_v61 }
0x1051   : > { %v5847_v62 = vsel %vm1015_vm1, %v5846_v17, 0.0 }
0x1052   : > { %5848 = vadd.xlane.f32.xlu0 %v5847_v62 }
0x10df   : > { %v5849_v51 = vpop.xlane.xlu0 %5848 }
0x10e0   : > { %v5850_v48 = vmul.f32 0.03125, %v5849_v51 }
0x10e2   : > { %v5851_v3 = vadd.f32 1e-05, %v5850_v48 }
0x10e4   : > { %6614 = vrsqrt.f32 %v5851_v3 }
0x10ee   : > { %v6615_v4 = vpop.eup %6614 }
0x10ef   : > { %v5853_v7 = vmul.f32 %v6615_v4, %v5845_v61 }
0x10f1   : > { %v5861_v9 = vmul.f32 %v6247_v5, %v5853_v7 }
0x10f3   : > { %v5869_v10 = vadd.f32 %v6248_v26, %v5861_v9 }
0x10f5   : > { %v5870_v11 = vpack.c.bf16 %v5869_v10, %v5869_v10  ;;  %v6022_v39 = vadd.f32 %v5869_v10, %v5869_v10 }
0x10f7   : > { %6494 = vmatmul.mubr.msk.bf16.vlgmr.msra.gmra.mrb[48].mxu0 %vm1015_vm1, %v5870_v11 }
0x11ca   : > { %v5931_v15 = vpop.f32.mrb[48].mxu0 }
0x11cb   : > { %v5932_v16 = vadd.f32 %v6249_v14, %v5931_v15  ;;  %v6495_v19 = vpop.f32.mrb[49].mxu0 }
0x11cc   : > { %v5934_v20 = vpop.f32.mrb[50].mxu0 }
0x11cd   : > { %v5937_v22 = vmax.f32 %v5932_v16, 0.0  ;;  %v6496_v23 = vpop.f32.mrb[51].mxu0 }
0x11cf   : > { %v5938_v24 = vpack.c.bf16 %v5937_v22, %v5937_v22 }
0x11d1   : > { %6506 = vmatmul.mubr.msk.bf16.vlgmr.msra.gmra.mrb[48].mxu1 %vm5978_vm6, %v5938_v24 }
0x12a4   : > { %v6016_v33 = vpop.f32.mrb[48].mxu1 }
0x12a5   : > { %v6017_v37 = vadd.f32 %v6253_v31, %v6016_v33  ;;  %v6507_v40 = vpop.f32.mrb[49].mxu1 }
0x12a6   : > { %v6019_v41 = vpop.f32.mrb[50].mxu1 }
0x12a7   : > { %v6023_v35 = vadd.f32 %v6022_v39, %v6017_v37  ;;  %v6508_v1 = vpop.f32.mrb[51].mxu1 }
0x12a9   : > { %v6024_v21 = vsel %vm1015_vm1, %v6023_v35, 0.0 }
0x12aa   : > { %6025 = vadd.xlane.f32.xlu1 %v6024_v21 }
0x1337   : > { %v6026_v28 = vpop.xlane.xlu1 %6025 }
0x1338   : > { %v6027_v42 = vmul.f32 0.03125, %v6026_v28 }
0x133a   : > { %v6028_v43 = vsub.f32 %v6023_v35, %v6027_v42 }
0x133c   : > { %v6029_v44 = vmul.f32 %v6028_v43, %v6028_v43 }
0x133e   : > { %v6030_v27 = vsel %vm1015_vm1, %v6029_v44, 0.0 }
0x133f   : > { %6031 = vadd.xlane.f32.xlu0 %v6030_v27 }
0x13cc   : > { %v6032_v30 = vpop.xlane.xlu0 %6031 }
0x13cd   : > { %v6033_v45 = vmul.f32 0.03125, %v6032_v30 }
0x13cf   : > { %v6034_v58 = vadd.f32 1e-05, %v6033_v45 }
0x13d1   : > { %6616 = vrsqrt.f32 %v6034_v58 }
0x13db   : > { %v6617_v32 = vpop.eup %6616 }
0x13dc   : > { %v6036_v46 = vmul.f32 %v6617_v32, %v6028_v43 }
0x13de   : > { %v6044_v13 = vmul.f32 %v6259_v34, %v6036_v46 }
0x13e0   : > { %v6052_v29 = vadd.f32 %v6260_v49, %v6044_v13 }
0x13e2   : > { %6053 = vst.msk [vmem:[%s982_s22] sm:$0xff] %vm1015_vm1, %v6052_v29 }
0x13e3 PF: > { %s71_s15 = sadd.s32 1, %s6626_s15  }
0x13e4   : > { %p68_p4 = scmp.ge.s32.totalorder %s71_s15, 4  }
0x13e6   :  { %70 = sbr.rel (!%p68_p4) target bundleno = 45 (0x2d), region = 209 }

</bundles_post_ra>
